<compile_context>
chip_gen: v6e
topology: v6e:2x2x1
jax: 0.10.0
libtpu: 0.0.40
codegen_flags: <defaults>
</compile_context>

<pallas_src>
import jax
import jax.numpy as jnp
import numpy as np
from jax.experimental import pallas as pl
from jax.experimental.pallas import tpu as pltpu


def seq2seq_kernel(
    emb_q_ref,      # (T, B, E)   bf16  pre-embedded questions (time-major)
    enc_wih_ref,    # (E, 4H)     bf16  (g-quarter pre-scaled x2)
    enc_whh_ref,    # (H, 4H)     bf16  (g-quarter pre-scaled x2)
    enc_b_ref,      # (1, 4H)     f32   b_ih + b_hh (g-quarter pre-scaled x2)
    dec_tab_ref,    # (P, 4H)     bf16  emb_tab[:P] @ W_ih_dec (g-scaled)
    dec_start_ref,  # (1, 4H)     f32   emb_tab[start] @ W_ih_dec (g-scaled)
    dec_whh_ref,    # (H, 4H)     bf16  (g-scaled)
    dec_b_ref,      # (1, 4H)     f32   b_ih + b_hh (g-scaled)
    fc_w_ref,       # (H, Pp)     bf16  zero-padded to lane-dense Pp
    fc_b_ref,       # (1, Pp)     f32   pad lanes = -1e30
    logits_ref,     # out (S, B, Pp) f32
    xproj_ref,      # scratch (T*B, 4H) f32
):
    T, B, E = emb_q_ref.shape
    H = enc_whh_ref.shape[0]
    P = dec_tab_ref.shape[0]
    S, _, Pp = logits_ref.shape
    f32 = jnp.float32
    bf16 = jnp.bfloat16

    # ---- prologue: load constant operands once, pre-broadcast biases --------
    enc_whh = enc_whh_ref[...]
    dec_tab = dec_tab_ref[...]
    dec_whh = dec_whh_ref[...]
    fc_w = fc_w_ref[...]
    dec_b_bc = jnp.broadcast_to(dec_b_ref[...], (B, 4 * H))
    fc_b_bc = jnp.broadcast_to(fc_b_ref[...], (B, Pp))

    # ---- encoder input projection hoisted out of the recurrence -------------
    # One big (T*B, E) @ (E, 4H) MXU call, results parked in VMEM scratch.
    x_flat = emb_q_ref[...].reshape(T * B, E)
    xproj_ref[...] = (
        jnp.dot(x_flat, enc_wih_ref[...], preferred_element_type=f32)
        + enc_b_ref[...]
    )

    def cell(gates, c):
        # Gate pre-activations have x2 folded into the g-quarter by the wrapper,
        # so a single 4H-wide sigmoid gives i, f, o and g = 2*sigma(2z)-1 = tanh(z).
        sig = jax.nn.sigmoid(gates)
        i = sig[:, 0 * H:1 * H]
        f = sig[:, 1 * H:2 * H]
        g = 2.0 * sig[:, 2 * H:3 * H] - 1.0
        o = sig[:, 3 * H:4 * H]
        c_new = f * c + i * g
        h_new = o * jnp.tanh(c_new)
        return h_new, c_new

    # ---- encoder recurrence (fully unrolled; T small & static) --------------
    h = jnp.zeros((B, H), f32)
    c = jnp.zeros((B, H), f32)
    h_bf = h.astype(bf16)
    for t in range(T):
        gates = xproj_ref[t * B:(t + 1) * B, :] + jnp.dot(
            h_bf, enc_whh, preferred_element_type=f32)
        h, c = cell(gates, c)
        h_bf = h.astype(bf16)

    # ---- greedy decoder (no teacher forcing), fully unrolled ----------------
    lane_pp = jax.lax.broadcasted_iota(jnp.int32, (B, Pp), 1)  # padded-logit lanes
    lane_p = jax.lax.broadcasted_iota(jnp.int32, (B, P), 1)    # program-vocab lanes
    x_dec = jnp.broadcast_to(dec_start_ref[...], (B, 4 * H))   # step-0 fused emb @ W_ih
    for s in range(S):
        gates = x_dec + jnp.dot(h_bf, dec_whh, preferred_element_type=f32) + dec_b_bc
        h, c = cell(gates, c)
        h_bf = h.astype(bf16)
        logits = jnp.dot(h_bf, fc_w, preferred_element_type=f32) + fc_b_bc   # (B, Pp)
        logits_ref[s, :, :] = logits            # per-step lane-dense store
        # greedy token for feedback; pad lanes carry -1e30 bias so tok < P always
        max_v = jnp.max(logits, axis=-1, keepdims=True)
        tok = jnp.min(
            jnp.where(logits == max_v, lane_pp, Pp), axis=-1, keepdims=True
        ).astype(jnp.int32)                                                  # (B, 1)
        if s + 1 < S:
            # embedding lookup fused into the input projection: onehot @ (emb @ W_ih)
            onehot = (lane_p == tok).astype(bf16)                            # (B, P)
            x_dec = jnp.dot(onehot, dec_tab, preferred_element_type=f32)


def seq2seq_forward(questions, params, *, program_seq_len, program_start_token_idx):
    """questions: (B, T) int32. Returns (generated (B,S) int32, logits (B,S,P) f32)."""
    emb_tab = params["embedding"]                         # (V, E) f32
    B, T = questions.shape
    V, E = emb_tab.shape
    H = params["enc_whh"].shape[0]
    P = params["fc_w"].shape[1]
    S = program_seq_len
    P_pad = ((P + 127) // 128) * 128

    # Decoder re-embeds its own predictions through the shared question table,
    # so program-vocab ids must be valid question-vocab ids (as in the torch model).
    assert P <= V and 0 <= program_start_token_idx < V

    def scale_g(m):
        # fold x2 into the g-quarter (columns [2H, 3H)) so tanh(z) = 2*sigmoid(2z)-1
        scale = jnp.concatenate([
            jnp.ones((2 * H,), jnp.float32),
            jnp.full((H,), 2.0, jnp.float32),
            jnp.ones((H,), jnp.float32),
        ])
        return m * scale

    # encoder weights: g-scaled, bf16 for the MXU (cast here, not in the kernel)
    enc_wih = scale_g(params["enc_wih"]).astype(jnp.bfloat16)
    enc_whh = scale_g(params["enc_whh"]).astype(jnp.bfloat16)
    enc_b = scale_g(params["enc_b"])                                   # f32

    # decoder: fuse embedding into the input projection; keep only the P rows a
    # greedy-decoded token can hit, start token fed via its own precomputed row.
    dec_emb_wih = scale_g(jnp.dot(emb_tab, params["dec_wih"]))         # (V, 4H) f32
    dec_tab = dec_emb_wih[:P].astype(jnp.bfloat16)                     # (P, 4H)
    dec_start = dec_emb_wih[program_start_token_idx][None, :]          # (1, 4H) f32
    dec_whh = scale_g(params["dec_whh"]).astype(jnp.bfloat16)
    dec_b = scale_g(params["dec_b"])                                   # f32

    # fc head padded to a lane-dense 128-wide output; pad bias very negative so
    # the in-kernel greedy argmax can never select a pad lane.
    fc_w = jnp.pad(params["fc_w"], ((0, 0), (0, P_pad - P))).astype(jnp.bfloat16)
    fc_b = jnp.pad(params["fc_b"], ((0, 0), (0, P_pad - P)), constant_values=-1e30)

    # glue: question embedding lookup + transpose to time-major, bf16
    emb_q = jnp.take(emb_tab, questions, axis=0)                       # (B, T, E)
    emb_q = jnp.transpose(emb_q, (1, 0, 2)).astype(jnp.bfloat16)       # (T, B, E)

    # Batch tiling: sublane-aligned; >= 2 tiles whenever B > 8 so the "parallel"
    # grid axis has work for both v7x TensorCores; capped at 128 (v5e MXU width).
    if B > 8:
        B_TILE = min(128, (((B + 1) // 2 + 7) // 8) * 8)
    else:
        B_TILE = ((B + 7) // 8) * 8
    B_pad = ((B + B_TILE - 1) // B_TILE) * B_TILE
    if B_pad != B:
        emb_q = jnp.pad(emb_q, ((0, 0), (0, B_pad - B), (0, 0)))

    def const_spec(shape):
        return pl.BlockSpec(shape, lambda b: (0,) * len(shape))

    # Explicit VMEM budget (double-buffered ins/out + scratch), clamped to v7x's 64 MiB.
    def nbytes(shape, dt):
        return int(np.prod(shape)) * jnp.dtype(dt).itemsize
    vmem_budget = 2 * (
        nbytes((T, B_TILE, E), jnp.bfloat16)
        + nbytes((E, 4 * H), jnp.bfloat16)
        + 2 * nbytes((H, 4 * H), jnp.bfloat16)
        + 3 * nbytes((1, 4 * H), jnp.float32)
        + nbytes((P, 4 * H), jnp.bfloat16)
        + nbytes((H, P_pad), jnp.bfloat16)
        + nbytes((1, P_pad), jnp.float32)
        + nbytes((S, B_TILE, P_pad), jnp.float32)
    ) + nbytes((T * B_TILE, 4 * H), jnp.float32)
    vmem_limit = int(min(64 << 20, max(16 << 20, 2 * vmem_budget)))
    # TODO(synk): single-buffer the constant weight blocks (pipeline_mode=pl.Buffered(1))
    # once buffer_count=1 is confirmed supported end-to-end on the target JAX build.

    logits_pad = pl.pallas_call(
        seq2seq_kernel,
        out_shape=jax.ShapeDtypeStruct((S, B_pad, P_pad), jnp.float32),
        grid=(B_pad // B_TILE,),
        in_specs=[
            pl.BlockSpec((T, B_TILE, E), lambda b: (0, b, 0)),   # emb_q
            const_spec((E, 4 * H)),                              # enc_wih
            const_spec((H, 4 * H)),                              # enc_whh
            const_spec((1, 4 * H)),                              # enc_b
            const_spec((P, 4 * H)),                              # dec_tab (emb @ W_ih, P rows)
            const_spec((1, 4 * H)),                              # dec_start row
            const_spec((H, 4 * H)),                              # dec_whh
            const_spec((1, 4 * H)),                              # dec_b
            const_spec((H, P_pad)),                              # fc_w (lane-padded)
            const_spec((1, P_pad)),                              # fc_b (lane-padded, -1e30)
        ],
        out_specs=pl.BlockSpec((S, B_TILE, P_pad), lambda b: (0, b, 0)),
        scratch_shapes=[pltpu.VMEM((T * B_TILE, 4 * H), jnp.float32)],
        compiler_params=pltpu.CompilerParams(
            dimension_semantics=("parallel",),
            vmem_limit_bytes=vmem_limit),
    )(emb_q, enc_wih, enc_whh, enc_b, dec_tab, dec_start, dec_whh, dec_b, fc_w, fc_b)

    logits = jnp.transpose(logits_pad[:, :B, :P], (1, 0, 2))           # (B, S, P) f32
    # Greedy tokens recomputed outside the kernel (jnp.argmax uses the same
    # first-index tie-break as torch.max and matches the kernel's feedback tokens).
    generated = jnp.argmax(logits, axis=-1).astype(jnp.int32)          # (B, S)
    return generated, logits


def init_params(key, vocab_size, embedding_dim, lstm_hidden_dim, program_vocab_size):
    V, E, H, P = vocab_size, embedding_dim, lstm_hidden_dim, program_vocab_size
    ks = jax.random.split(key, 12)
    k_scale = 1.0 / np.sqrt(H)

    def uni(k, shape):
        return jax.random.uniform(k, shape, jnp.float32, -k_scale, k_scale)

    emb = jax.random.normal(ks[0], (V, E), jnp.float32)
    emb = emb.at[0].set(0.0)  # padding_idx=0

    params = {
        "embedding": emb,
        # LSTM weights stored pre-transposed: W_ih^T (E,4H), W_hh^T (H,4H); biases summed.
        "enc_wih": uni(ks[1], (E, 4 * H)),
        "enc_whh": uni(ks[2], (H, 4 * H)),
        "enc_b": uni(ks[3], (1, 4 * H)) + uni(ks[4], (1, 4 * H)),
        "dec_wih": uni(ks[5], (E, 4 * H)),
        "dec_whh": uni(ks[6], (H, 4 * H)),
        "dec_b": uni(ks[7], (1, 4 * H)) + uni(ks[8], (1, 4 * H)),
        "fc_w": uni(ks[9], (H, P)),
        "fc_b": uni(ks[10], (1, P)),
    }
    return params, ks[11]


if __name__ == "__main__":
    # small, module-consistent sizes
    vocab_size = 32
    embedding_dim = 16
    lstm_hidden_dim = 32
    program_vocab_size = 16   # <= vocab_size so predicted tokens re-embed (as in the torch code)
    program_seq_len = 6
    program_start_token_idx = 1
    batch = 2
    question_len = 8

    key = jax.random.PRNGKey(0)
    params, kq = init_params(
        key, vocab_size, embedding_dim, lstm_hidden_dim, program_vocab_size
    )
    questions = jax.random.randint(kq, (batch, question_len), 1, vocab_size, dtype=jnp.int32)

    generated, logits = seq2seq_forward(
        questions,
        params,
        program_seq_len=program_seq_len,
        program_start_token_idx=program_start_token_idx,
    )
    generated = jax.block_until_ready(generated)
    logits = jax.block_until_ready(logits)

    assert generated.shape == (batch, program_seq_len)
    assert logits.shape == (batch, program_seq_len, program_vocab_size)
    assert generated.dtype == jnp.int32
    print("KERNEL_OK")
</pallas_src>

<mosaic_0001>
module attributes {stable_mosaic.version = 11 : i64} {
  func.func @seq2seq_kernel(%arg0: i32, %arg1: memref<8x8x16xbf16, #tpu.memory_space<vmem>>, %arg2: memref<16x128xbf16, #tpu.memory_space<vmem>>, %arg3: memref<32x128xbf16, #tpu.memory_space<vmem>>, %arg4: memref<1x128xf32, #tpu.memory_space<vmem>>, %arg5: memref<16x128xbf16, #tpu.memory_space<vmem>>, %arg6: memref<1x128xf32, #tpu.memory_space<vmem>>, %arg7: memref<32x128xbf16, #tpu.memory_space<vmem>>, %arg8: memref<1x128xf32, #tpu.memory_space<vmem>>, %arg9: memref<32x128xbf16, #tpu.memory_space<vmem>>, %arg10: memref<1x128xf32, #tpu.memory_space<vmem>>, %arg11: memref<6x8x128xf32, #tpu.memory_space<vmem>>, %arg12: memref<64x128xf32, #tpu.memory_space<vmem>>) attributes {dimension_semantics = [#tpu.dimension_semantics<parallel>], iteration_bounds = array<i64: 1>, scalar_prefetch = 0 : i64, scratch_operands = 1 : i64, tpu.core_type = #tpu.core_type<tc>, window_params = [{transform_indices = @transform_0, window_bounds = array<i64: 8, 8, 16>}, {pipeline_mode = #tpu.pipeline_mode<synchronous>, transform_indices = @transform_1, window_bounds = array<i64: 16, 128>}, {pipeline_mode = #tpu.pipeline_mode<synchronous>, transform_indices = @transform_2, window_bounds = array<i64: 32, 128>}, {pipeline_mode = #tpu.pipeline_mode<synchronous>, transform_indices = @transform_3, window_bounds = array<i64: 1, 128>}, {pipeline_mode = #tpu.pipeline_mode<synchronous>, transform_indices = @transform_4, window_bounds = array<i64: 16, 128>}, {pipeline_mode = #tpu.pipeline_mode<synchronous>, transform_indices = @transform_5, window_bounds = array<i64: 1, 128>}, {pipeline_mode = #tpu.pipeline_mode<synchronous>, transform_indices = @transform_6, window_bounds = array<i64: 32, 128>}, {pipeline_mode = #tpu.pipeline_mode<synchronous>, transform_indices = @transform_7, window_bounds = array<i64: 1, 128>}, {pipeline_mode = #tpu.pipeline_mode<synchronous>, transform_indices = @transform_8, window_bounds = array<i64: 32, 128>}, {pipeline_mode = #tpu.pipeline_mode<synchronous>, transform_indices = @transform_9, window_bounds = array<i64: 1, 128>}, {transform_indices = @transform_10, window_bounds = array<i64: 6, 8, 128>}]} {
    %c0 = arith.constant 0 : index
    %c0_0 = arith.constant 0 : index
    %0 = vector.load %arg3[%c0, %c0_0] : memref<32x128xbf16, #tpu.memory_space<vmem>>, vector<32x128xbf16>
    %c0_1 = arith.constant 0 : index
    %c0_2 = arith.constant 0 : index
    %1 = vector.load %arg5[%c0_1, %c0_2] : memref<16x128xbf16, #tpu.memory_space<vmem>>, vector<16x128xbf16>
    %c0_3 = arith.constant 0 : index
    %c0_4 = arith.constant 0 : index
    %2 = vector.load %arg7[%c0_3, %c0_4] : memref<32x128xbf16, #tpu.memory_space<vmem>>, vector<32x128xbf16>
    %c0_5 = arith.constant 0 : index
    %c0_6 = arith.constant 0 : index
    %3 = vector.load %arg9[%c0_5, %c0_6] : memref<32x128xbf16, #tpu.memory_space<vmem>>, vector<32x128xbf16>
    %c0_7 = arith.constant 0 : index
    %c0_8 = arith.constant 0 : index
    %4 = vector.load %arg8[%c0_7, %c0_8] : memref<1x128xf32, #tpu.memory_space<vmem>>, vector<1x128xf32>
    %5 = vector.shape_cast %4 : vector<1x128xf32> to vector<1x128xf32>
    %6 = vector.broadcast %5 : vector<1x128xf32> to vector<8x128xf32>
    %c0_9 = arith.constant 0 : index
    %c0_10 = arith.constant 0 : index
    %7 = vector.load %arg10[%c0_9, %c0_10] : memref<1x128xf32, #tpu.memory_space<vmem>>, vector<1x128xf32>
    %8 = vector.shape_cast %7 : vector<1x128xf32> to vector<1x128xf32>
    %9 = vector.broadcast %8 : vector<1x128xf32> to vector<8x128xf32>
    %c0_11 = arith.constant 0 : index
    %c0_12 = arith.constant 0 : index
    %c0_13 = arith.constant 0 : index
    %10 = vector.load %arg1[%c0_11, %c0_12, %c0_13] : memref<8x8x16xbf16, #tpu.memory_space<vmem>>, vector<8x8x16xbf16>
    %11 = vector.shape_cast %10 : vector<8x8x16xbf16> to vector<64x16xbf16>
    %c0_14 = arith.constant 0 : index
    %c0_15 = arith.constant 0 : index
    %12 = vector.load %arg2[%c0_14, %c0_15] : memref<16x128xbf16, #tpu.memory_space<vmem>>, vector<16x128xbf16>
    %cst = arith.constant dense<0.000000e+00> : vector<64x128xf32>
    %13 = tpu.matmul %11, %12, %cst {dimension_numbers = #tpu.dot_dimension_numbers<[1], [0], [0], [1], [0, 0, 1, 1], [], []>} : vector<64x16xbf16>, vector<16x128xbf16>, vector<64x128xf32> -> vector<64x128xf32>
    %c0_16 = arith.constant 0 : index
    %c0_17 = arith.constant 0 : index
    %14 = vector.load %arg4[%c0_16, %c0_17] : memref<1x128xf32, #tpu.memory_space<vmem>>, vector<1x128xf32>
    %15 = vector.broadcast %14 : vector<1x128xf32> to vector<64x128xf32>
    %16 = arith.addf %13, %15 : vector<64x128xf32>
    %c0_18 = arith.constant 0 : index
    %c0_19 = arith.constant 0 : index
    %17 = vector.load %arg12[%c0_18, %c0_19] : memref<64x128xf32, #tpu.memory_space<vmem>>, vector<64x128xf32>
    tpu.vector_store %arg12[%c0_18, %c0_19], %16 {strides = array<i32>} : memref<64x128xf32, #tpu.memory_space<vmem>>, vector<64x128xf32>,
    %cst_20 = arith.constant 0.000000e+00 : f32
    %18 = vector.broadcast %cst_20 : f32 to vector<8x32xf32>
    %cst_21 = arith.constant 0.000000e+00 : f32
    %19 = vector.broadcast %cst_21 : f32 to vector<8x32xf32>
    %20 = arith.truncf %18 : vector<8x32xf32> to vector<8x32xbf16>
    %c0_22 = arith.constant 0 : index
    %c0_23 = arith.constant 0 : index
    %21 = vector.load %arg12[%c0_22, %c0_23] : memref<64x128xf32, #tpu.memory_space<vmem>>, vector<8x128xf32>
    %cst_24 = arith.constant dense<0.000000e+00> : vector<8x128xf32>
    %22 = tpu.matmul %20, %0, %cst_24 {dimension_numbers = #tpu.dot_dimension_numbers<[1], [0], [0], [1], [0, 0, 1, 1], [], []>} : vector<8x32xbf16>, vector<32x128xbf16>, vector<8x128xf32> -> vector<8x128xf32>
    %23 = arith.addf %21, %22 : vector<8x128xf32>
    %24 = arith.negf %23 : vector<8x128xf32>
    %25 = math.exp %24 : vector<8x128xf32>
    %cst_25 = arith.constant 1.000000e+00 : f32
    %26 = vector.broadcast %cst_25 : f32 to vector<8x128xf32>
    %27 = arith.addf %26, %25 : vector<8x128xf32>
    %28 = arith.divf %26, %27 : vector<8x128xf32>
    %29 = vector.extract_strided_slice %28 {offsets = [0, 0], sizes = [8, 32], strides = [1, 1]} : vector<8x128xf32> to vector<8x32xf32>
    %30 = vector.extract_strided_slice %28 {offsets = [0, 32], sizes = [8, 32], strides = [1, 1]} : vector<8x128xf32> to vector<8x32xf32>
    %31 = vector.extract_strided_slice %28 {offsets = [0, 64], sizes = [8, 32], strides = [1, 1]} : vector<8x128xf32> to vector<8x32xf32>
    %cst_26 = arith.constant 2.000000e+00 : f32
    %32 = vector.broadcast %cst_26 : f32 to vector<8x32xf32>
    %33 = arith.mulf %32, %31 : vector<8x32xf32>
    %cst_27 = arith.constant 1.000000e+00 : f32
    %34 = vector.broadcast %cst_27 : f32 to vector<8x32xf32>
    %35 = arith.subf %33, %34 : vector<8x32xf32>
    %36 = vector.extract_strided_slice %28 {offsets = [0, 96], sizes = [8, 32], strides = [1, 1]} : vector<8x128xf32> to vector<8x32xf32>
    %37 = arith.mulf %30, %19 : vector<8x32xf32>
    %38 = arith.mulf %29, %35 : vector<8x32xf32>
    %39 = arith.addf %37, %38 : vector<8x32xf32>
    %40 = math.tanh %39 : vector<8x32xf32>
    %41 = arith.mulf %36, %40 : vector<8x32xf32>
    %42 = arith.truncf %41 : vector<8x32xf32> to vector<8x32xbf16>
    %c8 = arith.constant 8 : index
    %c0_28 = arith.constant 0 : index
    %43 = vector.load %arg12[%c8, %c0_28] : memref<64x128xf32, #tpu.memory_space<vmem>>, vector<8x128xf32>
    %cst_29 = arith.constant dense<0.000000e+00> : vector<8x128xf32>
    %44 = tpu.matmul %42, %0, %cst_29 {dimension_numbers = #tpu.dot_dimension_numbers<[1], [0], [0], [1], [0, 0, 1, 1], [], []>} : vector<8x32xbf16>, vector<32x128xbf16>, vector<8x128xf32> -> vector<8x128xf32>
    %45 = arith.addf %43, %44 : vector<8x128xf32>
    %46 = arith.negf %45 : vector<8x128xf32>
    %47 = math.exp %46 : vector<8x128xf32>
    %cst_30 = arith.constant 1.000000e+00 : f32
    %48 = vector.broadcast %cst_30 : f32 to vector<8x128xf32>
    %49 = arith.addf %48, %47 : vector<8x128xf32>
    %50 = arith.divf %48, %49 : vector<8x128xf32>
    %51 = vector.extract_strided_slice %50 {offsets = [0, 0], sizes = [8, 32], strides = [1, 1]} : vector<8x128xf32> to vector<8x32xf32>
    %52 = vector.extract_strided_slice %50 {offsets = [0, 32], sizes = [8, 32], strides = [1, 1]} : vector<8x128xf32> to vector<8x32xf32>
    %53 = vector.extract_strided_slice %50 {offsets = [0, 64], sizes = [8, 32], strides = [1, 1]} : vector<8x128xf32> to vector<8x32xf32>
    %cst_31 = arith.constant 2.000000e+00 : f32
    %54 = vector.broadcast %cst_31 : f32 to vector<8x32xf32>
    %55 = arith.mulf %54, %53 : vector<8x32xf32>
    %cst_32 = arith.constant 1.000000e+00 : f32
    %56 = vector.broadcast %cst_32 : f32 to vector<8x32xf32>
    %57 = arith.subf %55, %56 : vector<8x32xf32>
    %58 = vector.extract_strided_slice %50 {offsets = [0, 96], sizes = [8, 32], strides = [1, 1]} : vector<8x128xf32> to vector<8x32xf32>
    %59 = arith.mulf %52, %39 : vector<8x32xf32>
    %60 = arith.mulf %51, %57 : vector<8x32xf32>
    %61 = arith.addf %59, %60 : vector<8x32xf32>
    %62 = math.tanh %61 : vector<8x32xf32>
    %63 = arith.mulf %58, %62 : vector<8x32xf32>
    %64 = arith.truncf %63 : vector<8x32xf32> to vector<8x32xbf16>
    %c16 = arith.constant 16 : index
    %c0_33 = arith.constant 0 : index
    %65 = vector.load %arg12[%c16, %c0_33] : memref<64x128xf32, #tpu.memory_space<vmem>>, vector<8x128xf32>
    %cst_34 = arith.constant dense<0.000000e+00> : vector<8x128xf32>
    %66 = tpu.matmul %64, %0, %cst_34 {dimension_numbers = #tpu.dot_dimension_numbers<[1], [0], [0], [1], [0, 0, 1, 1], [], []>} : vector<8x32xbf16>, vector<32x128xbf16>, vector<8x128xf32> -> vector<8x128xf32>
    %67 = arith.addf %65, %66 : vector<8x128xf32>
    %68 = arith.negf %67 : vector<8x128xf32>
    %69 = math.exp %68 : vector<8x128xf32>
    %cst_35 = arith.constant 1.000000e+00 : f32
    %70 = vector.broadcast %cst_35 : f32 to vector<8x128xf32>
    %71 = arith.addf %70, %69 : vector<8x128xf32>
    %72 = arith.divf %70, %71 : vector<8x128xf32>
    %73 = vector.extract_strided_slice %72 {offsets = [0, 0], sizes = [8, 32], strides = [1, 1]} : vector<8x128xf32> to vector<8x32xf32>
    %74 = vector.extract_strided_slice %72 {offsets = [0, 32], sizes = [8, 32], strides = [1, 1]} : vector<8x128xf32> to vector<8x32xf32>
    %75 = vector.extract_strided_slice %72 {offsets = [0, 64], sizes = [8, 32], strides = [1, 1]} : vector<8x128xf32> to vector<8x32xf32>
    %cst_36 = arith.constant 2.000000e+00 : f32
    %76 = vector.broadcast %cst_36 : f32 to vector<8x32xf32>
    %77 = arith.mulf %76, %75 : vector<8x32xf32>
    %cst_37 = arith.constant 1.000000e+00 : f32
    %78 = vector.broadcast %cst_37 : f32 to vector<8x32xf32>
    %79 = arith.subf %77, %78 : vector<8x32xf32>
    %80 = vector.extract_strided_slice %72 {offsets = [0, 96], sizes = [8, 32], strides = [1, 1]} : vector<8x128xf32> to vector<8x32xf32>
    %81 = arith.mulf %74, %61 : vector<8x32xf32>
    %82 = arith.mulf %73, %79 : vector<8x32xf32>
    %83 = arith.addf %81, %82 : vector<8x32xf32>
    %84 = math.tanh %83 : vector<8x32xf32>
    %85 = arith.mulf %80, %84 : vector<8x32xf32>
    %86 = arith.truncf %85 : vector<8x32xf32> to vector<8x32xbf16>
    %c24 = arith.constant 24 : index
    %c0_38 = arith.constant 0 : index
    %87 = vector.load %arg12[%c24, %c0_38] : memref<64x128xf32, #tpu.memory_space<vmem>>, vector<8x128xf32>
    %cst_39 = arith.constant dense<0.000000e+00> : vector<8x128xf32>
    %88 = tpu.matmul %86, %0, %cst_39 {dimension_numbers = #tpu.dot_dimension_numbers<[1], [0], [0], [1], [0, 0, 1, 1], [], []>} : vector<8x32xbf16>, vector<32x128xbf16>, vector<8x128xf32> -> vector<8x128xf32>
    %89 = arith.addf %87, %88 : vector<8x128xf32>
    %90 = arith.negf %89 : vector<8x128xf32>
    %91 = math.exp %90 : vector<8x128xf32>
    %cst_40 = arith.constant 1.000000e+00 : f32
    %92 = vector.broadcast %cst_40 : f32 to vector<8x128xf32>
    %93 = arith.addf %92, %91 : vector<8x128xf32>
    %94 = arith.divf %92, %93 : vector<8x128xf32>
    %95 = vector.extract_strided_slice %94 {offsets = [0, 0], sizes = [8, 32], strides = [1, 1]} : vector<8x128xf32> to vector<8x32xf32>
    %96 = vector.extract_strided_slice %94 {offsets = [0, 32], sizes = [8, 32], strides = [1, 1]} : vector<8x128xf32> to vector<8x32xf32>
    %97 = vector.extract_strided_slice %94 {offsets = [0, 64], sizes = [8, 32], strides = [1, 1]} : vector<8x128xf32> to vector<8x32xf32>
    %cst_41 = arith.constant 2.000000e+00 : f32
    %98 = vector.broadcast %cst_41 : f32 to vector<8x32xf32>
    %99 = arith.mulf %98, %97 : vector<8x32xf32>
    %cst_42 = arith.constant 1.000000e+00 : f32
    %100 = vector.broadcast %cst_42 : f32 to vector<8x32xf32>
    %101 = arith.subf %99, %100 : vector<8x32xf32>
    %102 = vector.extract_strided_slice %94 {offsets = [0, 96], sizes = [8, 32], strides = [1, 1]} : vector<8x128xf32> to vector<8x32xf32>
    %103 = arith.mulf %96, %83 : vector<8x32xf32>
    %104 = arith.mulf %95, %101 : vector<8x32xf32>
    %105 = arith.addf %103, %104 : vector<8x32xf32>
    %106 = math.tanh %105 : vector<8x32xf32>
    %107 = arith.mulf %102, %106 : vector<8x32xf32>
    %108 = arith.truncf %107 : vector<8x32xf32> to vector<8x32xbf16>
    %c32 = arith.constant 32 : index
    %c0_43 = arith.constant 0 : index
    %109 = vector.load %arg12[%c32, %c0_43] : memref<64x128xf32, #tpu.memory_space<vmem>>, vector<8x128xf32>
    %cst_44 = arith.constant dense<0.000000e+00> : vector<8x128xf32>
    %110 = tpu.matmul %108, %0, %cst_44 {dimension_numbers = #tpu.dot_dimension_numbers<[1], [0], [0], [1], [0, 0, 1, 1], [], []>} : vector<8x32xbf16>, vector<32x128xbf16>, vector<8x128xf32> -> vector<8x128xf32>
    %111 = arith.addf %109, %110 : vector<8x128xf32>
    %112 = arith.negf %111 : vector<8x128xf32>
    %113 = math.exp %112 : vector<8x128xf32>
    %cst_45 = arith.constant 1.000000e+00 : f32
    %114 = vector.broadcast %cst_45 : f32 to vector<8x128xf32>
    %115 = arith.addf %114, %113 : vector<8x128xf32>
    %116 = arith.divf %114, %115 : vector<8x128xf32>
    %117 = vector.extract_strided_slice %116 {offsets = [0, 0], sizes = [8, 32], strides = [1, 1]} : vector<8x128xf32> to vector<8x32xf32>
    %118 = vector.extract_strided_slice %116 {offsets = [0, 32], sizes = [8, 32], strides = [1, 1]} : vector<8x128xf32> to vector<8x32xf32>
    %119 = vector.extract_strided_slice %116 {offsets = [0, 64], sizes = [8, 32], strides = [1, 1]} : vector<8x128xf32> to vector<8x32xf32>
    %cst_46 = arith.constant 2.000000e+00 : f32
    %120 = vector.broadcast %cst_46 : f32 to vector<8x32xf32>
    %121 = arith.mulf %120, %119 : vector<8x32xf32>
    %cst_47 = arith.constant 1.000000e+00 : f32
    %122 = vector.broadcast %cst_47 : f32 to vector<8x32xf32>
    %123 = arith.subf %121, %122 : vector<8x32xf32>
    %124 = vector.extract_strided_slice %116 {offsets = [0, 96], sizes = [8, 32], strides = [1, 1]} : vector<8x128xf32> to vector<8x32xf32>
    %125 = arith.mulf %118, %105 : vector<8x32xf32>
    %126 = arith.mulf %117, %123 : vector<8x32xf32>
    %127 = arith.addf %125, %126 : vector<8x32xf32>
    %128 = math.tanh %127 : vector<8x32xf32>
    %129 = arith.mulf %124, %128 : vector<8x32xf32>
    %130 = arith.truncf %129 : vector<8x32xf32> to vector<8x32xbf16>
    %c40 = arith.constant 40 : index
    %c0_48 = arith.constant 0 : index
    %131 = vector.load %arg12[%c40, %c0_48] : memref<64x128xf32, #tpu.memory_space<vmem>>, vector<8x128xf32>
    %cst_49 = arith.constant dense<0.000000e+00> : vector<8x128xf32>
    %132 = tpu.matmul %130, %0, %cst_49 {dimension_numbers = #tpu.dot_dimension_numbers<[1], [0], [0], [1], [0, 0, 1, 1], [], []>} : vector<8x32xbf16>, vector<32x128xbf16>, vector<8x128xf32> -> vector<8x128xf32>
    %133 = arith.addf %131, %132 : vector<8x128xf32>
    %134 = arith.negf %133 : vector<8x128xf32>
    %135 = math.exp %134 : vector<8x128xf32>
    %cst_50 = arith.constant 1.000000e+00 : f32
    %136 = vector.broadcast %cst_50 : f32 to vector<8x128xf32>
    %137 = arith.addf %136, %135 : vector<8x128xf32>
    %138 = arith.divf %136, %137 : vector<8x128xf32>
    %139 = vector.extract_strided_slice %138 {offsets = [0, 0], sizes = [8, 32], strides = [1, 1]} : vector<8x128xf32> to vector<8x32xf32>
    %140 = vector.extract_strided_slice %138 {offsets = [0, 32], sizes = [8, 32], strides = [1, 1]} : vector<8x128xf32> to vector<8x32xf32>
    %141 = vector.extract_strided_slice %138 {offsets = [0, 64], sizes = [8, 32], strides = [1, 1]} : vector<8x128xf32> to vector<8x32xf32>
    %cst_51 = arith.constant 2.000000e+00 : f32
    %142 = vector.broadcast %cst_51 : f32 to vector<8x32xf32>
    %143 = arith.mulf %142, %141 : vector<8x32xf32>
    %cst_52 = arith.constant 1.000000e+00 : f32
    %144 = vector.broadcast %cst_52 : f32 to vector<8x32xf32>
    %145 = arith.subf %143, %144 : vector<8x32xf32>
    %146 = vector.extract_strided_slice %138 {offsets = [0, 96], sizes = [8, 32], strides = [1, 1]} : vector<8x128xf32> to vector<8x32xf32>
    %147 = arith.mulf %140, %127 : vector<8x32xf32>
    %148 = arith.mulf %139, %145 : vector<8x32xf32>
    %149 = arith.addf %147, %148 : vector<8x32xf32>
    %150 = math.tanh %149 : vector<8x32xf32>
    %151 = arith.mulf %146, %150 : vector<8x32xf32>
    %152 = arith.truncf %151 : vector<8x32xf32> to vector<8x32xbf16>
    %c48 = arith.constant 48 : index
    %c0_53 = arith.constant 0 : index
    %153 = vector.load %arg12[%c48, %c0_53] : memref<64x128xf32, #tpu.memory_space<vmem>>, vector<8x128xf32>
    %cst_54 = arith.constant dense<0.000000e+00> : vector<8x128xf32>
    %154 = tpu.matmul %152, %0, %cst_54 {dimension_numbers = #tpu.dot_dimension_numbers<[1], [0], [0], [1], [0, 0, 1, 1], [], []>} : vector<8x32xbf16>, vector<32x128xbf16>, vector<8x128xf32> -> vector<8x128xf32>
    %155 = arith.addf %153, %154 : vector<8x128xf32>
    %156 = arith.negf %155 : vector<8x128xf32>
    %157 = math.exp %156 : vector<8x128xf32>
    %cst_55 = arith.constant 1.000000e+00 : f32
    %158 = vector.broadcast %cst_55 : f32 to vector<8x128xf32>
    %159 = arith.addf %158, %157 : vector<8x128xf32>
    %160 = arith.divf %158, %159 : vector<8x128xf32>
    %161 = vector.extract_strided_slice %160 {offsets = [0, 0], sizes = [8, 32], strides = [1, 1]} : vector<8x128xf32> to vector<8x32xf32>
    %162 = vector.extract_strided_slice %160 {offsets = [0, 32], sizes = [8, 32], strides = [1, 1]} : vector<8x128xf32> to vector<8x32xf32>
    %163 = vector.extract_strided_slice %160 {offsets = [0, 64], sizes = [8, 32], strides = [1, 1]} : vector<8x128xf32> to vector<8x32xf32>
    %cst_56 = arith.constant 2.000000e+00 : f32
    %164 = vector.broadcast %cst_56 : f32 to vector<8x32xf32>
    %165 = arith.mulf %164, %163 : vector<8x32xf32>
    %cst_57 = arith.constant 1.000000e+00 : f32
    %166 = vector.broadcast %cst_57 : f32 to vector<8x32xf32>
    %167 = arith.subf %165, %166 : vector<8x32xf32>
    %168 = vector.extract_strided_slice %160 {offsets = [0, 96], sizes = [8, 32], strides = [1, 1]} : vector<8x128xf32> to vector<8x32xf32>
    %169 = arith.mulf %162, %149 : vector<8x32xf32>
    %170 = arith.mulf %161, %167 : vector<8x32xf32>
    %171 = arith.addf %169, %170 : vector<8x32xf32>
    %172 = math.tanh %171 : vector<8x32xf32>
    %173 = arith.mulf %168, %172 : vector<8x32xf32>
    %174 = arith.truncf %173 : vector<8x32xf32> to vector<8x32xbf16>
    %c56 = arith.constant 56 : index
    %c0_58 = arith.constant 0 : index
    %175 = vector.load %arg12[%c56, %c0_58] : memref<64x128xf32, #tpu.memory_space<vmem>>, vector<8x128xf32>
    %cst_59 = arith.constant dense<0.000000e+00> : vector<8x128xf32>
    %176 = tpu.matmul %174, %0, %cst_59 {dimension_numbers = #tpu.dot_dimension_numbers<[1], [0], [0], [1], [0, 0, 1, 1], [], []>} : vector<8x32xbf16>, vector<32x128xbf16>, vector<8x128xf32> -> vector<8x128xf32>
    %177 = arith.addf %175, %176 : vector<8x128xf32>
    %178 = arith.negf %177 : vector<8x128xf32>
    %179 = math.exp %178 : vector<8x128xf32>
    %cst_60 = arith.constant 1.000000e+00 : f32
    %180 = vector.broadcast %cst_60 : f32 to vector<8x128xf32>
    %181 = arith.addf %180, %179 : vector<8x128xf32>
    %182 = arith.divf %180, %181 : vector<8x128xf32>
    %183 = vector.extract_strided_slice %182 {offsets = [0, 0], sizes = [8, 32], strides = [1, 1]} : vector<8x128xf32> to vector<8x32xf32>
    %184 = vector.extract_strided_slice %182 {offsets = [0, 32], sizes = [8, 32], strides = [1, 1]} : vector<8x128xf32> to vector<8x32xf32>
    %185 = vector.extract_strided_slice %182 {offsets = [0, 64], sizes = [8, 32], strides = [1, 1]} : vector<8x128xf32> to vector<8x32xf32>
    %cst_61 = arith.constant 2.000000e+00 : f32
    %186 = vector.broadcast %cst_61 : f32 to vector<8x32xf32>
    %187 = arith.mulf %186, %185 : vector<8x32xf32>
    %cst_62 = arith.constant 1.000000e+00 : f32
    %188 = vector.broadcast %cst_62 : f32 to vector<8x32xf32>
    %189 = arith.subf %187, %188 : vector<8x32xf32>
    %190 = vector.extract_strided_slice %182 {offsets = [0, 96], sizes = [8, 32], strides = [1, 1]} : vector<8x128xf32> to vector<8x32xf32>
    %191 = arith.mulf %184, %171 : vector<8x32xf32>
    %192 = arith.mulf %183, %189 : vector<8x32xf32>
    %193 = arith.addf %191, %192 : vector<8x32xf32>
    %194 = math.tanh %193 : vector<8x32xf32>
    %195 = arith.mulf %190, %194 : vector<8x32xf32>
    %196 = arith.truncf %195 : vector<8x32xf32> to vector<8x32xbf16>
    %197 = tpu.iota {dimensions = array<i32: 1>} : vector<8x128xi32>
    %198 = tpu.iota {dimensions = array<i32: 1>} : vector<8x16xi32>
    %c0_63 = arith.constant 0 : index
    %c0_64 = arith.constant 0 : index
    %199 = vector.load %arg6[%c0_63, %c0_64] : memref<1x128xf32, #tpu.memory_space<vmem>>, vector<1x128xf32>
    %200 = vector.shape_cast %199 : vector<1x128xf32> to vector<1x128xf32>
    %201 = vector.broadcast %200 : vector<1x128xf32> to vector<8x128xf32>
    %cst_65 = arith.constant dense<0.000000e+00> : vector<8x128xf32>
    %202 = tpu.matmul %196, %2, %cst_65 {dimension_numbers = #tpu.dot_dimension_numbers<[1], [0], [0], [1], [0, 0, 1, 1], [], []>} : vector<8x32xbf16>, vector<32x128xbf16>, vector<8x128xf32> -> vector<8x128xf32>
    %203 = arith.addf %201, %202 : vector<8x128xf32>
    %204 = arith.addf %203, %6 : vector<8x128xf32>
    %205 = arith.negf %204 : vector<8x128xf32>
    %206 = math.exp %205 : vector<8x128xf32>
    %cst_66 = arith.constant 1.000000e+00 : f32
    %207 = vector.broadcast %cst_66 : f32 to vector<8x128xf32>
    %208 = arith.addf %207, %206 : vector<8x128xf32>
    %209 = arith.divf %207, %208 : vector<8x128xf32>
    %210 = vector.extract_strided_slice %209 {offsets = [0, 0], sizes = [8, 32], strides = [1, 1]} : vector<8x128xf32> to vector<8x32xf32>
    %211 = vector.extract_strided_slice %209 {offsets = [0, 32], sizes = [8, 32], strides = [1, 1]} : vector<8x128xf32> to vector<8x32xf32>
    %212 = vector.extract_strided_slice %209 {offsets = [0, 64], sizes = [8, 32], strides = [1, 1]} : vector<8x128xf32> to vector<8x32xf32>
    %cst_67 = arith.constant 2.000000e+00 : f32
    %213 = vector.broadcast %cst_67 : f32 to vector<8x32xf32>
    %214 = arith.mulf %213, %212 : vector<8x32xf32>
    %cst_68 = arith.constant 1.000000e+00 : f32
    %215 = vector.broadcast %cst_68 : f32 to vector<8x32xf32>
    %216 = arith.subf %214, %215 : vector<8x32xf32>
    %217 = vector.extract_strided_slice %209 {offsets = [0, 96], sizes = [8, 32], strides = [1, 1]} : vector<8x128xf32> to vector<8x32xf32>
    %218 = arith.mulf %211, %193 : vector<8x32xf32>
    %219 = arith.mulf %210, %216 : vector<8x32xf32>
    %220 = arith.addf %218, %219 : vector<8x32xf32>
    %221 = math.tanh %220 : vector<8x32xf32>
    %222 = arith.mulf %217, %221 : vector<8x32xf32>
    %223 = arith.truncf %222 : vector<8x32xf32> to vector<8x32xbf16>
    %cst_69 = arith.constant dense<0.000000e+00> : vector<8x128xf32>
    %224 = tpu.matmul %223, %3, %cst_69 {dimension_numbers = #tpu.dot_dimension_numbers<[1], [0], [0], [1], [0, 0, 1, 1], [], []>} : vector<8x32xbf16>, vector<32x128xbf16>, vector<8x128xf32> -> vector<8x128xf32>
    %225 = arith.addf %224, %9 : vector<8x128xf32>
    %c0_70 = arith.constant 0 : index
    %c0_71 = arith.constant 0 : index
    %c0_72 = arith.constant 0 : index
    %226 = vector.load %arg11[%c0_70, %c0_71, %c0_72] : memref<6x8x128xf32, #tpu.memory_space<vmem>>, vector<1x8x128xf32>
    %227 = vector.shape_cast %226 : vector<1x8x128xf32> to vector<8x128xf32>
    %228 = vector.shape_cast %225 : vector<8x128xf32> to vector<1x8x128xf32>
    tpu.vector_store %arg11[%c0_70, %c0_71, %c0_72], %228 {strides = array<i32>} : memref<6x8x128xf32, #tpu.memory_space<vmem>>, vector<1x8x128xf32>,
    %cst_73 = arith.constant dense<0xFF800000> : vector<8xf32>
    %229 = vector.multi_reduction <maximumf>, %225, %cst_73 [1] : vector<8x128xf32> to vector<8xf32>
    %230 = vector.shape_cast %229 : vector<8xf32> to vector<8x1xf32>
    %231 = vector.broadcast %230 : vector<8x1xf32> to vector<8x128xf32>
    %232 = arith.cmpf oeq, %225, %231 : vector<8x128xf32>
    %c128_i32 = arith.constant 128 : i32
    %233 = vector.broadcast %c128_i32 : i32 to vector<8x128xi32>
    %234 = arith.select %232, %197, %233 : vector<8x128xi1>, vector<8x128xi32>
    %cst_74 = arith.constant dense<2147483647> : vector<8xi32>
    %235 = vector.multi_reduction <minsi>, %234, %cst_74 [1] : vector<8x128xi32> to vector<8xi32>
    %236 = vector.shape_cast %235 : vector<8xi32> to vector<8x1xi32>
    %237 = vector.broadcast %236 : vector<8x1xi32> to vector<8x16xi32>
    %238 = arith.cmpi eq, %198, %237 : vector<8x16xi32>
    %239 = arith.extui %238 : vector<8x16xi1> to vector<8x16xi32>
    %240 = arith.sitofp %239 : vector<8x16xi32> to vector<8x16xf32>
    %241 = arith.truncf %240 : vector<8x16xf32> to vector<8x16xbf16>
    %cst_75 = arith.constant dense<0.000000e+00> : vector<8x128xf32>
    %242 = tpu.matmul %241, %1, %cst_75 {dimension_numbers = #tpu.dot_dimension_numbers<[1], [0], [0], [1], [0, 0, 1, 1], [], []>} : vector<8x16xbf16>, vector<16x128xbf16>, vector<8x128xf32> -> vector<8x128xf32>
    %cst_76 = arith.constant dense<0.000000e+00> : vector<8x128xf32>
    %243 = tpu.matmul %223, %2, %cst_76 {dimension_numbers = #tpu.dot_dimension_numbers<[1], [0], [0], [1], [0, 0, 1, 1], [], []>} : vector<8x32xbf16>, vector<32x128xbf16>, vector<8x128xf32> -> vector<8x128xf32>
    %244 = arith.addf %242, %243 : vector<8x128xf32>
    %245 = arith.addf %244, %6 : vector<8x128xf32>
    %246 = arith.negf %245 : vector<8x128xf32>
    %247 = math.exp %246 : vector<8x128xf32>
    %cst_77 = arith.constant 1.000000e+00 : f32
    %248 = vector.broadcast %cst_77 : f32 to vector<8x128xf32>
    %249 = arith.addf %248, %247 : vector<8x128xf32>
    %250 = arith.divf %248, %249 : vector<8x128xf32>
    %251 = vector.extract_strided_slice %250 {offsets = [0, 0], sizes = [8, 32], strides = [1, 1]} : vector<8x128xf32> to vector<8x32xf32>
    %252 = vector.extract_strided_slice %250 {offsets = [0, 32], sizes = [8, 32], strides = [1, 1]} : vector<8x128xf32> to vector<8x32xf32>
    %253 = vector.extract_strided_slice %250 {offsets = [0, 64], sizes = [8, 32], strides = [1, 1]} : vector<8x128xf32> to vector<8x32xf32>
    %cst_78 = arith.constant 2.000000e+00 : f32
    %254 = vector.broadcast %cst_78 : f32 to vector<8x32xf32>
    %255 = arith.mulf %254, %253 : vector<8x32xf32>
    %cst_79 = arith.constant 1.000000e+00 : f32
    %256 = vector.broadcast %cst_79 : f32 to vector<8x32xf32>
    %257 = arith.subf %255, %256 : vector<8x32xf32>
    %258 = vector.extract_strided_slice %250 {offsets = [0, 96], sizes = [8, 32], strides = [1, 1]} : vector<8x128xf32> to vector<8x32xf32>
    %259 = arith.mulf %252, %220 : vector<8x32xf32>
    %260 = arith.mulf %251, %257 : vector<8x32xf32>
    %261 = arith.addf %259, %260 : vector<8x32xf32>
    %262 = math.tanh %261 : vector<8x32xf32>
    %263 = arith.mulf %258, %262 : vector<8x32xf32>
    %264 = arith.truncf %263 : vector<8x32xf32> to vector<8x32xbf16>
    %cst_80 = arith.constant dense<0.000000e+00> : vector<8x128xf32>
    %265 = tpu.matmul %264, %3, %cst_80 {dimension_numbers = #tpu.dot_dimension_numbers<[1], [0], [0], [1], [0, 0, 1, 1], [], []>} : vector<8x32xbf16>, vector<32x128xbf16>, vector<8x128xf32> -> vector<8x128xf32>
    %266 = arith.addf %265, %9 : vector<8x128xf32>
    %c1 = arith.constant 1 : index
    %c0_81 = arith.constant 0 : index
    %c0_82 = arith.constant 0 : index
    %267 = vector.load %arg11[%c1, %c0_81, %c0_82] : memref<6x8x128xf32, #tpu.memory_space<vmem>>, vector<1x8x128xf32>
    %268 = vector.shape_cast %267 : vector<1x8x128xf32> to vector<8x128xf32>
    %269 = vector.shape_cast %266 : vector<8x128xf32> to vector<1x8x128xf32>
    tpu.vector_store %arg11[%c1, %c0_81, %c0_82], %269 {strides = array<i32>} : memref<6x8x128xf32, #tpu.memory_space<vmem>>, vector<1x8x128xf32>,
    %cst_83 = arith.constant dense<0xFF800000> : vector<8xf32>
    %270 = vector.multi_reduction <maximumf>, %266, %cst_83 [1] : vector<8x128xf32> to vector<8xf32>
    %271 = vector.shape_cast %270 : vector<8xf32> to vector<8x1xf32>
    %272 = vector.broadcast %271 : vector<8x1xf32> to vector<8x128xf32>
    %273 = arith.cmpf oeq, %266, %272 : vector<8x128xf32>
    %c128_i32_84 = arith.constant 128 : i32
    %274 = vector.broadcast %c128_i32_84 : i32 to vector<8x128xi32>
    %275 = arith.select %273, %197, %274 : vector<8x128xi1>, vector<8x128xi32>
    %cst_85 = arith.constant dense<2147483647> : vector<8xi32>
    %276 = vector.multi_reduction <minsi>, %275, %cst_85 [1] : vector<8x128xi32> to vector<8xi32>
    %277 = vector.shape_cast %276 : vector<8xi32> to vector<8x1xi32>
    %278 = vector.broadcast %277 : vector<8x1xi32> to vector<8x16xi32>
    %279 = arith.cmpi eq, %198, %278 : vector<8x16xi32>
    %280 = arith.extui %279 : vector<8x16xi1> to vector<8x16xi32>
    %281 = arith.sitofp %280 : vector<8x16xi32> to vector<8x16xf32>
    %282 = arith.truncf %281 : vector<8x16xf32> to vector<8x16xbf16>
    %cst_86 = arith.constant dense<0.000000e+00> : vector<8x128xf32>
    %283 = tpu.matmul %282, %1, %cst_86 {dimension_numbers = #tpu.dot_dimension_numbers<[1], [0], [0], [1], [0, 0, 1, 1], [], []>} : vector<8x16xbf16>, vector<16x128xbf16>, vector<8x128xf32> -> vector<8x128xf32>
    %cst_87 = arith.constant dense<0.000000e+00> : vector<8x128xf32>
    %284 = tpu.matmul %264, %2, %cst_87 {dimension_numbers = #tpu.dot_dimension_numbers<[1], [0], [0], [1], [0, 0, 1, 1], [], []>} : vector<8x32xbf16>, vector<32x128xbf16>, vector<8x128xf32> -> vector<8x128xf32>
    %285 = arith.addf %283, %284 : vector<8x128xf32>
    %286 = arith.addf %285, %6 : vector<8x128xf32>
    %287 = arith.negf %286 : vector<8x128xf32>
    %288 = math.exp %287 : vector<8x128xf32>
    %cst_88 = arith.constant 1.000000e+00 : f32
    %289 = vector.broadcast %cst_88 : f32 to vector<8x128xf32>
    %290 = arith.addf %289, %288 : vector<8x128xf32>
    %291 = arith.divf %289, %290 : vector<8x128xf32>
    %292 = vector.extract_strided_slice %291 {offsets = [0, 0], sizes = [8, 32], strides = [1, 1]} : vector<8x128xf32> to vector<8x32xf32>
    %293 = vector.extract_strided_slice %291 {offsets = [0, 32], sizes = [8, 32], strides = [1, 1]} : vector<8x128xf32> to vector<8x32xf32>
    %294 = vector.extract_strided_slice %291 {offsets = [0, 64], sizes = [8, 32], strides = [1, 1]} : vector<8x128xf32> to vector<8x32xf32>
    %cst_89 = arith.constant 2.000000e+00 : f32
    %295 = vector.broadcast %cst_89 : f32 to vector<8x32xf32>
    %296 = arith.mulf %295, %294 : vector<8x32xf32>
    %cst_90 = arith.constant 1.000000e+00 : f32
    %297 = vector.broadcast %cst_90 : f32 to vector<8x32xf32>
    %298 = arith.subf %296, %297 : vector<8x32xf32>
    %299 = vector.extract_strided_slice %291 {offsets = [0, 96], sizes = [8, 32], strides = [1, 1]} : vector<8x128xf32> to vector<8x32xf32>
    %300 = arith.mulf %293, %261 : vector<8x32xf32>
    %301 = arith.mulf %292, %298 : vector<8x32xf32>
    %302 = arith.addf %300, %301 : vector<8x32xf32>
    %303 = math.tanh %302 : vector<8x32xf32>
    %304 = arith.mulf %299, %303 : vector<8x32xf32>
    %305 = arith.truncf %304 : vector<8x32xf32> to vector<8x32xbf16>
    %cst_91 = arith.constant dense<0.000000e+00> : vector<8x128xf32>
    %306 = tpu.matmul %305, %3, %cst_91 {dimension_numbers = #tpu.dot_dimension_numbers<[1], [0], [0], [1], [0, 0, 1, 1], [], []>} : vector<8x32xbf16>, vector<32x128xbf16>, vector<8x128xf32> -> vector<8x128xf32>
    %307 = arith.addf %306, %9 : vector<8x128xf32>
    %c2 = arith.constant 2 : index
    %c0_92 = arith.constant 0 : index
    %c0_93 = arith.constant 0 : index
    %308 = vector.load %arg11[%c2, %c0_92, %c0_93] : memref<6x8x128xf32, #tpu.memory_space<vmem>>, vector<1x8x128xf32>
    %309 = vector.shape_cast %308 : vector<1x8x128xf32> to vector<8x128xf32>
    %310 = vector.shape_cast %307 : vector<8x128xf32> to vector<1x8x128xf32>
    tpu.vector_store %arg11[%c2, %c0_92, %c0_93], %310 {strides = array<i32>} : memref<6x8x128xf32, #tpu.memory_space<vmem>>, vector<1x8x128xf32>,
    %cst_94 = arith.constant dense<0xFF800000> : vector<8xf32>
    %311 = vector.multi_reduction <maximumf>, %307, %cst_94 [1] : vector<8x128xf32> to vector<8xf32>
    %312 = vector.shape_cast %311 : vector<8xf32> to vector<8x1xf32>
    %313 = vector.broadcast %312 : vector<8x1xf32> to vector<8x128xf32>
    %314 = arith.cmpf oeq, %307, %313 : vector<8x128xf32>
    %c128_i32_95 = arith.constant 128 : i32
    %315 = vector.broadcast %c128_i32_95 : i32 to vector<8x128xi32>
    %316 = arith.select %314, %197, %315 : vector<8x128xi1>, vector<8x128xi32>
    %cst_96 = arith.constant dense<2147483647> : vector<8xi32>
    %317 = vector.multi_reduction <minsi>, %316, %cst_96 [1] : vector<8x128xi32> to vector<8xi32>
    %318 = vector.shape_cast %317 : vector<8xi32> to vector<8x1xi32>
    %319 = vector.broadcast %318 : vector<8x1xi32> to vector<8x16xi32>
    %320 = arith.cmpi eq, %198, %319 : vector<8x16xi32>
    %321 = arith.extui %320 : vector<8x16xi1> to vector<8x16xi32>
    %322 = arith.sitofp %321 : vector<8x16xi32> to vector<8x16xf32>
    %323 = arith.truncf %322 : vector<8x16xf32> to vector<8x16xbf16>
    %cst_97 = arith.constant dense<0.000000e+00> : vector<8x128xf32>
    %324 = tpu.matmul %323, %1, %cst_97 {dimension_numbers = #tpu.dot_dimension_numbers<[1], [0], [0], [1], [0, 0, 1, 1], [], []>} : vector<8x16xbf16>, vector<16x128xbf16>, vector<8x128xf32> -> vector<8x128xf32>
    %cst_98 = arith.constant dense<0.000000e+00> : vector<8x128xf32>
    %325 = tpu.matmul %305, %2, %cst_98 {dimension_numbers = #tpu.dot_dimension_numbers<[1], [0], [0], [1], [0, 0, 1, 1], [], []>} : vector<8x32xbf16>, vector<32x128xbf16>, vector<8x128xf32> -> vector<8x128xf32>
    %326 = arith.addf %324, %325 : vector<8x128xf32>
    %327 = arith.addf %326, %6 : vector<8x128xf32>
    %328 = arith.negf %327 : vector<8x128xf32>
    %329 = math.exp %328 : vector<8x128xf32>
    %cst_99 = arith.constant 1.000000e+00 : f32
    %330 = vector.broadcast %cst_99 : f32 to vector<8x128xf32>
    %331 = arith.addf %330, %329 : vector<8x128xf32>
    %332 = arith.divf %330, %331 : vector<8x128xf32>
    %333 = vector.extract_strided_slice %332 {offsets = [0, 0], sizes = [8, 32], strides = [1, 1]} : vector<8x128xf32> to vector<8x32xf32>
    %334 = vector.extract_strided_slice %332 {offsets = [0, 32], sizes = [8, 32], strides = [1, 1]} : vector<8x128xf32> to vector<8x32xf32>
    %335 = vector.extract_strided_slice %332 {offsets = [0, 64], sizes = [8, 32], strides = [1, 1]} : vector<8x128xf32> to vector<8x32xf32>
    %cst_100 = arith.constant 2.000000e+00 : f32
    %336 = vector.broadcast %cst_100 : f32 to vector<8x32xf32>
    %337 = arith.mulf %336, %335 : vector<8x32xf32>
    %cst_101 = arith.constant 1.000000e+00 : f32
    %338 = vector.broadcast %cst_101 : f32 to vector<8x32xf32>
    %339 = arith.subf %337, %338 : vector<8x32xf32>
    %340 = vector.extract_strided_slice %332 {offsets = [0, 96], sizes = [8, 32], strides = [1, 1]} : vector<8x128xf32> to vector<8x32xf32>
    %341 = arith.mulf %334, %302 : vector<8x32xf32>
    %342 = arith.mulf %333, %339 : vector<8x32xf32>
    %343 = arith.addf %341, %342 : vector<8x32xf32>
    %344 = math.tanh %343 : vector<8x32xf32>
    %345 = arith.mulf %340, %344 : vector<8x32xf32>
    %346 = arith.truncf %345 : vector<8x32xf32> to vector<8x32xbf16>
    %cst_102 = arith.constant dense<0.000000e+00> : vector<8x128xf32>
    %347 = tpu.matmul %346, %3, %cst_102 {dimension_numbers = #tpu.dot_dimension_numbers<[1], [0], [0], [1], [0, 0, 1, 1], [], []>} : vector<8x32xbf16>, vector<32x128xbf16>, vector<8x128xf32> -> vector<8x128xf32>
    %348 = arith.addf %347, %9 : vector<8x128xf32>
    %c3 = arith.constant 3 : index
    %c0_103 = arith.constant 0 : index
    %c0_104 = arith.constant 0 : index
    %349 = vector.load %arg11[%c3, %c0_103, %c0_104] : memref<6x8x128xf32, #tpu.memory_space<vmem>>, vector<1x8x128xf32>
    %350 = vector.shape_cast %349 : vector<1x8x128xf32> to vector<8x128xf32>
    %351 = vector.shape_cast %348 : vector<8x128xf32> to vector<1x8x128xf32>
    tpu.vector_store %arg11[%c3, %c0_103, %c0_104], %351 {strides = array<i32>} : memref<6x8x128xf32, #tpu.memory_space<vmem>>, vector<1x8x128xf32>,
    %cst_105 = arith.constant dense<0xFF800000> : vector<8xf32>
    %352 = vector.multi_reduction <maximumf>, %348, %cst_105 [1] : vector<8x128xf32> to vector<8xf32>
    %353 = vector.shape_cast %352 : vector<8xf32> to vector<8x1xf32>
    %354 = vector.broadcast %353 : vector<8x1xf32> to vector<8x128xf32>
    %355 = arith.cmpf oeq, %348, %354 : vector<8x128xf32>
    %c128_i32_106 = arith.constant 128 : i32
    %356 = vector.broadcast %c128_i32_106 : i32 to vector<8x128xi32>
    %357 = arith.select %355, %197, %356 : vector<8x128xi1>, vector<8x128xi32>
    %cst_107 = arith.constant dense<2147483647> : vector<8xi32>
    %358 = vector.multi_reduction <minsi>, %357, %cst_107 [1] : vector<8x128xi32> to vector<8xi32>
    %359 = vector.shape_cast %358 : vector<8xi32> to vector<8x1xi32>
    %360 = vector.broadcast %359 : vector<8x1xi32> to vector<8x16xi32>
    %361 = arith.cmpi eq, %198, %360 : vector<8x16xi32>
    %362 = arith.extui %361 : vector<8x16xi1> to vector<8x16xi32>
    %363 = arith.sitofp %362 : vector<8x16xi32> to vector<8x16xf32>
    %364 = arith.truncf %363 : vector<8x16xf32> to vector<8x16xbf16>
    %cst_108 = arith.constant dense<0.000000e+00> : vector<8x128xf32>
    %365 = tpu.matmul %364, %1, %cst_108 {dimension_numbers = #tpu.dot_dimension_numbers<[1], [0], [0], [1], [0, 0, 1, 1], [], []>} : vector<8x16xbf16>, vector<16x128xbf16>, vector<8x128xf32> -> vector<8x128xf32>
    %cst_109 = arith.constant dense<0.000000e+00> : vector<8x128xf32>
    %366 = tpu.matmul %346, %2, %cst_109 {dimension_numbers = #tpu.dot_dimension_numbers<[1], [0], [0], [1], [0, 0, 1, 1], [], []>} : vector<8x32xbf16>, vector<32x128xbf16>, vector<8x128xf32> -> vector<8x128xf32>
    %367 = arith.addf %365, %366 : vector<8x128xf32>
    %368 = arith.addf %367, %6 : vector<8x128xf32>
    %369 = arith.negf %368 : vector<8x128xf32>
    %370 = math.exp %369 : vector<8x128xf32>
    %cst_110 = arith.constant 1.000000e+00 : f32
    %371 = vector.broadcast %cst_110 : f32 to vector<8x128xf32>
    %372 = arith.addf %371, %370 : vector<8x128xf32>
    %373 = arith.divf %371, %372 : vector<8x128xf32>
    %374 = vector.extract_strided_slice %373 {offsets = [0, 0], sizes = [8, 32], strides = [1, 1]} : vector<8x128xf32> to vector<8x32xf32>
    %375 = vector.extract_strided_slice %373 {offsets = [0, 32], sizes = [8, 32], strides = [1, 1]} : vector<8x128xf32> to vector<8x32xf32>
    %376 = vector.extract_strided_slice %373 {offsets = [0, 64], sizes = [8, 32], strides = [1, 1]} : vector<8x128xf32> to vector<8x32xf32>
    %cst_111 = arith.constant 2.000000e+00 : f32
    %377 = vector.broadcast %cst_111 : f32 to vector<8x32xf32>
    %378 = arith.mulf %377, %376 : vector<8x32xf32>
    %cst_112 = arith.constant 1.000000e+00 : f32
    %379 = vector.broadcast %cst_112 : f32 to vector<8x32xf32>
    %380 = arith.subf %378, %379 : vector<8x32xf32>
    %381 = vector.extract_strided_slice %373 {offsets = [0, 96], sizes = [8, 32], strides = [1, 1]} : vector<8x128xf32> to vector<8x32xf32>
    %382 = arith.mulf %375, %343 : vector<8x32xf32>
    %383 = arith.mulf %374, %380 : vector<8x32xf32>
    %384 = arith.addf %382, %383 : vector<8x32xf32>
    %385 = math.tanh %384 : vector<8x32xf32>
    %386 = arith.mulf %381, %385 : vector<8x32xf32>
    %387 = arith.truncf %386 : vector<8x32xf32> to vector<8x32xbf16>
    %cst_113 = arith.constant dense<0.000000e+00> : vector<8x128xf32>
    %388 = tpu.matmul %387, %3, %cst_113 {dimension_numbers = #tpu.dot_dimension_numbers<[1], [0], [0], [1], [0, 0, 1, 1], [], []>} : vector<8x32xbf16>, vector<32x128xbf16>, vector<8x128xf32> -> vector<8x128xf32>
    %389 = arith.addf %388, %9 : vector<8x128xf32>
    %c4 = arith.constant 4 : index
    %c0_114 = arith.constant 0 : index
    %c0_115 = arith.constant 0 : index
    %390 = vector.load %arg11[%c4, %c0_114, %c0_115] : memref<6x8x128xf32, #tpu.memory_space<vmem>>, vector<1x8x128xf32>
    %391 = vector.shape_cast %390 : vector<1x8x128xf32> to vector<8x128xf32>
    %392 = vector.shape_cast %389 : vector<8x128xf32> to vector<1x8x128xf32>
    tpu.vector_store %arg11[%c4, %c0_114, %c0_115], %392 {strides = array<i32>} : memref<6x8x128xf32, #tpu.memory_space<vmem>>, vector<1x8x128xf32>,
    %cst_116 = arith.constant dense<0xFF800000> : vector<8xf32>
    %393 = vector.multi_reduction <maximumf>, %389, %cst_116 [1] : vector<8x128xf32> to vector<8xf32>
    %394 = vector.shape_cast %393 : vector<8xf32> to vector<8x1xf32>
    %395 = vector.broadcast %394 : vector<8x1xf32> to vector<8x128xf32>
    %396 = arith.cmpf oeq, %389, %395 : vector<8x128xf32>
    %c128_i32_117 = arith.constant 128 : i32
    %397 = vector.broadcast %c128_i32_117 : i32 to vector<8x128xi32>
    %398 = arith.select %396, %197, %397 : vector<8x128xi1>, vector<8x128xi32>
    %cst_118 = arith.constant dense<2147483647> : vector<8xi32>
    %399 = vector.multi_reduction <minsi>, %398, %cst_118 [1] : vector<8x128xi32> to vector<8xi32>
    %400 = vector.shape_cast %399 : vector<8xi32> to vector<8x1xi32>
    %401 = vector.broadcast %400 : vector<8x1xi32> to vector<8x16xi32>
    %402 = arith.cmpi eq, %198, %401 : vector<8x16xi32>
    %403 = arith.extui %402 : vector<8x16xi1> to vector<8x16xi32>
    %404 = arith.sitofp %403 : vector<8x16xi32> to vector<8x16xf32>
    %405 = arith.truncf %404 : vector<8x16xf32> to vector<8x16xbf16>
    %cst_119 = arith.constant dense<0.000000e+00> : vector<8x128xf32>
    %406 = tpu.matmul %405, %1, %cst_119 {dimension_numbers = #tpu.dot_dimension_numbers<[1], [0], [0], [1], [0, 0, 1, 1], [], []>} : vector<8x16xbf16>, vector<16x128xbf16>, vector<8x128xf32> -> vector<8x128xf32>
    %cst_120 = arith.constant dense<0.000000e+00> : vector<8x128xf32>
    %407 = tpu.matmul %387, %2, %cst_120 {dimension_numbers = #tpu.dot_dimension_numbers<[1], [0], [0], [1], [0, 0, 1, 1], [], []>} : vector<8x32xbf16>, vector<32x128xbf16>, vector<8x128xf32> -> vector<8x128xf32>
    %408 = arith.addf %406, %407 : vector<8x128xf32>
    %409 = arith.addf %408, %6 : vector<8x128xf32>
    %410 = arith.negf %409 : vector<8x128xf32>
    %411 = math.exp %410 : vector<8x128xf32>
    %cst_121 = arith.constant 1.000000e+00 : f32
    %412 = vector.broadcast %cst_121 : f32 to vector<8x128xf32>
    %413 = arith.addf %412, %411 : vector<8x128xf32>
    %414 = arith.divf %412, %413 : vector<8x128xf32>
    %415 = vector.extract_strided_slice %414 {offsets = [0, 0], sizes = [8, 32], strides = [1, 1]} : vector<8x128xf32> to vector<8x32xf32>
    %416 = vector.extract_strided_slice %414 {offsets = [0, 32], sizes = [8, 32], strides = [1, 1]} : vector<8x128xf32> to vector<8x32xf32>
    %417 = vector.extract_strided_slice %414 {offsets = [0, 64], sizes = [8, 32], strides = [1, 1]} : vector<8x128xf32> to vector<8x32xf32>
    %cst_122 = arith.constant 2.000000e+00 : f32
    %418 = vector.broadcast %cst_122 : f32 to vector<8x32xf32>
    %419 = arith.mulf %418, %417 : vector<8x32xf32>
    %cst_123 = arith.constant 1.000000e+00 : f32
    %420 = vector.broadcast %cst_123 : f32 to vector<8x32xf32>
    %421 = arith.subf %419, %420 : vector<8x32xf32>
    %422 = vector.extract_strided_slice %414 {offsets = [0, 96], sizes = [8, 32], strides = [1, 1]} : vector<8x128xf32> to vector<8x32xf32>
    %423 = arith.mulf %416, %384 : vector<8x32xf32>
    %424 = arith.mulf %415, %421 : vector<8x32xf32>
    %425 = arith.addf %423, %424 : vector<8x32xf32>
    %426 = math.tanh %425 : vector<8x32xf32>
    %427 = arith.mulf %422, %426 : vector<8x32xf32>
    %428 = arith.truncf %427 : vector<8x32xf32> to vector<8x32xbf16>
    %cst_124 = arith.constant dense<0.000000e+00> : vector<8x128xf32>
    %429 = tpu.matmul %428, %3, %cst_124 {dimension_numbers = #tpu.dot_dimension_numbers<[1], [0], [0], [1], [0, 0, 1, 1], [], []>} : vector<8x32xbf16>, vector<32x128xbf16>, vector<8x128xf32> -> vector<8x128xf32>
    %430 = arith.addf %429, %9 : vector<8x128xf32>
    %c5 = arith.constant 5 : index
    %c0_125 = arith.constant 0 : index
    %c0_126 = arith.constant 0 : index
    %431 = vector.load %arg11[%c5, %c0_125, %c0_126] : memref<6x8x128xf32, #tpu.memory_space<vmem>>, vector<1x8x128xf32>
    %432 = vector.shape_cast %431 : vector<1x8x128xf32> to vector<8x128xf32>
    %433 = vector.shape_cast %430 : vector<8x128xf32> to vector<1x8x128xf32>
    tpu.vector_store %arg11[%c5, %c0_125, %c0_126], %433 {strides = array<i32>} : memref<6x8x128xf32, #tpu.memory_space<vmem>>, vector<1x8x128xf32>,
    return
  }
  func.func @transform_0(%arg0: i32) -> (i32, i32, i32) {
    %c0_i32 = arith.constant 0 : i32
    %c0_i32_0 = arith.constant 0 : i32
    %c0_i32_1 = arith.constant 0 : i32
    return %c0_i32, %arg0, %c0_i32_0 : i32, i32, i32
  }
  func.func @transform_1(%arg0: i32) -> (i32, i32) {
    %c0_i32 = arith.constant 0 : i32
    %c0_i32_0 = arith.constant 0 : i32
    %c0_i32_1 = arith.constant 0 : i32
    return %c0_i32, %c0_i32_0 : i32, i32
  }
  func.func @transform_2(%arg0: i32) -> (i32, i32) {
    %c0_i32 = arith.constant 0 : i32
    %c0_i32_0 = arith.constant 0 : i32
    %c0_i32_1 = arith.constant 0 : i32
    return %c0_i32, %c0_i32_0 : i32, i32
  }
  func.func @transform_3(%arg0: i32) -> (i32, i32) {
    %c0_i32 = arith.constant 0 : i32
    %c0_i32_0 = arith.constant 0 : i32
    %c0_i32_1 = arith.constant 0 : i32
    return %c0_i32, %c0_i32_0 : i32, i32
  }
  func.func @transform_4(%arg0: i32) -> (i32, i32) {
    %c0_i32 = arith.constant 0 : i32
    %c0_i32_0 = arith.constant 0 : i32
    %c0_i32_1 = arith.constant 0 : i32
    return %c0_i32, %c0_i32_0 : i32, i32
  }
  func.func @transform_5(%arg0: i32) -> (i32, i32) {
    %c0_i32 = arith.constant 0 : i32
    %c0_i32_0 = arith.constant 0 : i32
    %c0_i32_1 = arith.constant 0 : i32
    return %c0_i32, %c0_i32_0 : i32, i32
  }
  func.func @transform_6(%arg0: i32) -> (i32, i32) {
    %c0_i32 = arith.constant 0 : i32
    %c0_i32_0 = arith.constant 0 : i32
    %c0_i32_1 = arith.constant 0 : i32
    return %c0_i32, %c0_i32_0 : i32, i32
  }
  func.func @transform_7(%arg0: i32) -> (i32, i32) {
    %c0_i32 = arith.constant 0 : i32
    %c0_i32_0 = arith.constant 0 : i32
    %c0_i32_1 = arith.constant 0 : i32
    return %c0_i32, %c0_i32_0 : i32, i32
  }
  func.func @transform_8(%arg0: i32) -> (i32, i32) {
    %c0_i32 = arith.constant 0 : i32
    %c0_i32_0 = arith.constant 0 : i32
    %c0_i32_1 = arith.constant 0 : i32
    return %c0_i32, %c0_i32_0 : i32, i32
  }
  func.func @transform_9(%arg0: i32) -> (i32, i32) {
    %c0_i32 = arith.constant 0 : i32
    %c0_i32_0 = arith.constant 0 : i32
    %c0_i32_1 = arith.constant 0 : i32
    return %c0_i32, %c0_i32_0 : i32, i32
  }
  func.func @transform_10(%arg0: i32) -> (i32, i32, i32) {
    %c0_i32 = arith.constant 0 : i32
    %c0_i32_0 = arith.constant 0 : i32
    %c0_i32_1 = arith.constant 0 : i32
    return %c0_i32, %arg0, %c0_i32_0 : i32, i32, i32
  }
}

</mosaic_0001>

<bundles_post_ra>
// kernel: tpu_custom_call.1
= control target key start
LH: loop header
LB: loop body
LE: loop exit
PB: predicated region body
PF: predicated region fallthrough
CT: control target
= control target key end

     0   :  { %15 = vsyncpa [#allocation4], 0  ;;  %s3011_s0 = inlined_call_operand.hbm [shape: bf16[8,8,16], index: 0, kind: input, shape index: {}]   ;;  %s3012_s1 = inlined_call_operand.hbm [shape: bf16[16,128], index: 1, kind: input, shape index: {}]   ;;  %s3013_s2 = inlined_call_operand.hbm [shape: bf16[32,128], index: 2, kind: input, shape index: {}]   ;;  %s3014_s3 = inlined_call_operand.vmem [shape: f32[1,128], index: 3, kind: input, shape index: {}]   ;;  %s3015_s4 = inlined_call_operand.hbm [shape: bf16[16,128], index: 4, kind: input, shape index: {}]   ;;  %s3016_s5 = inlined_call_operand.vmem [shape: f32[1,128], index: 5, kind: input, shape index: {}]   ;;  %s3017_s6 = inlined_call_operand.hbm [shape: bf16[32,128], index: 6, kind: input, shape index: {}]   ;;  %s3018_s7 = inlined_call_operand.vmem [shape: f32[1,128], index: 7, kind: input, shape index: {}]   ;;  %s3019_s8 = inlined_call_operand.hbm [shape: bf16[32,128], index: 8, kind: input, shape index: {}]   ;;  %s3020_s9 = inlined_call_operand.vmem [shape: f32[1,128], index: 9, kind: input, shape index: {}]   ;;  %s3021_s10 = inlined_call_operand.hbm [shape: f32[6,8,128], index: 10, kind: output, shape index: {}]  }
   0x1   :  { %16 = vsyncpa [#allocation7], 0 }
   0x2   :  { %17 = vsyncpa [#allocation10], 0 }
   0x3   :  { %18 = vsyncpa [#allocation13], 0 }
   0x4   :  { %19 = vsyncpa [#allocation5], 0  ;;  %s2571_s13 = smov [#allocation6]   ;;  %s2572_s15 = smov [#allocation9]  }
   0x5   :  { %s37_s14 = sshll.u32 %s2571_s13, 4  ;;  %s63_s16 = sshll.u32 %s2572_s15, 4  ;;  %s38_s14 = int_to_ptr.vmem [resolvable:$true] %s37_s14  ;;  %s64_s16 = int_to_ptr.vmem [resolvable:$true] %s63_s16 }
   0x6   :  { %s2429_s17 = scalar_lea.vmem %s38_s14, 128  ;;  %p2434_p1 = scmp.lt.s32.totalorder %s38_s14, %s38_s14 }
   0x7   :  { %p2430_p0 = scmp.ne.s32.totalorder %s38_s14, %s2429_s17  ;;  %p2435_p2 = scmp.lt.s32.totalorder %s2429_s17, %s2429_s17 }
   0x9   :  { %p2436_p3 = por %p2435_p2, %p2434_p1 }
   0xb   :  { %p2437_p4 = pnand %p2436_p3, %p2430_p0 }
   0xd   :  { %2440 = shalt.err (!%p2437_p4)
}
   0xe   :  { %s2573_s18 = smov 64   ;;  %s2574_s19 = smov 4  }
   0xf   :  { %43 = dma.hbm_to_vmem [thread:$0]  %s3012_s1, 128, %s38_s14, [#allocation7], %s2573_s18, %s2573_s18, %s2574_s19  }
  0x10   :  { %s2449_s22 = scalar_lea.vmem %s64_s16, 128  ;;  %p2454_p6 = scmp.lt.s32.totalorder %s64_s16, %s64_s16 }
  0x11   :  { %p2450_p5 = scmp.ne.s32.totalorder %s64_s16, %s2449_s22  ;;  %p2455_p7 = scmp.lt.s32.totalorder %s2449_s22, %s2449_s22 }
  0x13   :  { %p2456_p8 = por %p2455_p7, %p2454_p6 }
  0x15   :  { %p2457_p9 = pnand %p2456_p8, %p2450_p5 }
  0x17   :  { %2460 = shalt.err (!%p2457_p9)
}
  0x18   :  { %69 = dma.hbm_to_vmem [thread:$0]  %s3015_s4, 128, %s64_s16, [#allocation10], %s2573_s18, %s2573_s18, %s2574_s19  }
  0x19   :  { %s2575_s25 = smov [#allocation3]   ;;  %s2576_s27 = smov [#allocation8]  }
  0x1a   :  { %s25_s26 = sshll.u32 %s2575_s25, 4  ;;  %s49_s28 = sshll.u32 %s2576_s27, 4  ;;  %s26_s26 = int_to_ptr.vmem [resolvable:$true] %s25_s26  ;;  %s50_s28 = int_to_ptr.vmem [resolvable:$true] %s49_s28 }
  0x1b   :  { %s2469_s1 = scalar_lea.vmem %s26_s26, 512  ;;  %p2474_p11 = scmp.lt.s32.totalorder %s26_s26, %s26_s26 }
  0x1c   :  { %p2470_p10 = scmp.ne.s32.totalorder %s26_s26, %s2469_s1  ;;  %p2475_p12 = scmp.lt.s32.totalorder %s2469_s1, %s2469_s1 }
  0x1e   :  { %p2476_p13 = por %p2475_p12, %p2474_p11 }
  0x20   :  { %p2477_p0 = pnand %p2476_p13, %p2470_p10 }
  0x22   :  { %2480 = shalt.err (!%p2477_p0)
}
  0x23   :  { %31 = dma.hbm_to_vmem [thread:$0]  %s3011_s0, 512, %s26_s26, [#allocation4], %s2573_s18, %s2573_s18, %s2574_s19  }
  0x24   :  { %s2489_s4 = scalar_lea.vmem %s50_s28, 256  ;;  %p2494_p2 = scmp.lt.s32.totalorder %s50_s28, %s50_s28 }
  0x25   :  { %p2490_p1 = scmp.ne.s32.totalorder %s50_s28, %s2489_s4  ;;  %p2495_p3 = scmp.lt.s32.totalorder %s2489_s4, %s2489_s4 }
  0x27   :  { %p2496_p4 = por %p2495_p3, %p2494_p2 }
  0x29   :  { %p2497_p5 = pnand %p2496_p4, %p2490_p1 }
  0x2b   :  { %2500 = shalt.err (!%p2497_p5)
}
  0x2c   :  { %55 = dma.hbm_to_vmem [thread:$0]  %s3013_s2, 256, %s50_s28, [#allocation7], %s2573_s18, %s2573_s18, %s2574_s19  }
  0x2d   :  { %s2577_s13 = smov [#allocation11]   ;;  %s2578_s15 = smov [#allocation12]  }
  0x2e   :  { %s77_s14 = sshll.u32 %s2577_s13, 4  ;;  %s91_s16 = sshll.u32 %s2578_s15, 4  ;;  %s78_s14 = int_to_ptr.vmem [resolvable:$true] %s77_s14  ;;  %s92_s16 = int_to_ptr.vmem [resolvable:$true] %s91_s16 }
  0x2f   :  { %s2509_s0 = scalar_lea.vmem %s78_s14, 256  ;;  %p2514_p7 = scmp.lt.s32.totalorder %s78_s14, %s78_s14 }
  0x30   :  { %p2510_p6 = scmp.ne.s32.totalorder %s78_s14, %s2509_s0  ;;  %p2515_p8 = scmp.lt.s32.totalorder %s2509_s0, %s2509_s0 }
  0x32   :  { %p2516_p9 = por %p2515_p8, %p2514_p7 }
  0x34   :  { %p2517_p10 = pnand %p2516_p9, %p2510_p6 }
  0x36   :  { %2520 = shalt.err (!%p2517_p10)
}
  0x37   :  { %83 = dma.hbm_to_vmem [thread:$0]  %s3017_s6, 256, %s78_s14, [#allocation10], %s2573_s18, %s2573_s18, %s2574_s19  }
  0x38   :  { %s2529_s2 = scalar_lea.vmem %s92_s16, 256  ;;  %p2534_p12 = scmp.lt.s32.totalorder %s92_s16, %s92_s16 }
  0x39   :  { %p2530_p11 = scmp.ne.s32.totalorder %s92_s16, %s2529_s2  ;;  %p2535_p13 = scmp.lt.s32.totalorder %s2529_s2, %s2529_s2 }
  0x3b   :  { %p2536_p0 = por %p2535_p13, %p2534_p12 }
  0x3d   :  { %p2537_p1 = pnand %p2536_p0, %p2530_p11 }
  0x3f   :  { %2540 = shalt.err (!%p2537_p1)
}
  0x40   :  { %97 = dma.hbm_to_vmem [thread:$0]  %s3019_s8, 256, %s92_s16, [#allocation13], %s2573_s18, %s2573_s18, %s2574_s19  }
  0x41   :  { %2561 = dma.done.wait [#allocation4], 512  }
  0x42   :  { %2562 = vsyncadd [#allocation4], 4294966784 }
  0x43   :  { %2563 = dma.done.wait [#allocation7], 384  }
  0x44   :  { %2564 = vsyncadd [#allocation7], 4294966912 }
  0x45   :  { %2565 = dma.done.wait [#allocation10], 384  }
  0x46   :  { %2566 = vsyncadd [#allocation10], 4294966912 }
  0x47   :  { %2567 = dma.done.wait [#allocation13], 256  }
  0x48   :  { %2568 = vsyncadd [#allocation13], 4294967040  ;;  %v2579_v0 = vmov 0.0   ;;  %vm2580_vm0 = vmmov 0   ;;  %v2325_v1 = vld [vmem:[#allocation6] sm:$0xff]   ;;  %v2680_v2 = vld [vmem:[#allocation8 + $0x8] sm:$0xff]  }
  0x49   :  { %2120 = vmatprep.subr.bf16.mxu1 %v2579_v0  ;;  %2124 = vmatprep.mubr.msk.bf16.mxu1 %vm2580_vm0, %v2579_v0  ;;  %vm190_vm1 = vcmask 130048   ;;  %v2327_v3 = vld [vmem:[#allocation3] sm:$0xff]   ;;  %v2328_v4 = vld [vmem:[#allocation3 + $0x8] sm:$0xff]   ;;  %v2581_v6 = vmov 0   ;;  %vm289_vm2 = vcmask 261120   ;;  %v2330_v51 = vld [vmem:[#allocation3 + $0x10] sm:$0xff]  }
  0x4a   :  { %2110 = vmatprep.subr.bf16.mxu0 %v2325_v1  ;;  %2121 = vmatpush3.bf16.msra.mxu1 %v2680_v2  ;;  %v2685_v5 = vld [vmem:[#allocation8] sm:$0xff]   ;;  %v2706_v8 = vld [vmem:[%s3014_s3] ss:$0 sm:$0xff]  ;;  %s2582_s3 = smov 32   ;;  %v2331_v52 = vld [vmem:[#allocation3 + $0x18] sm:$0xff]  }
  0x4b   :  { %2111 = vmatpush3.bf16.msra.mxu0 %v2325_v1  ;;  %2112 = vmatprep.mubr.msk.bf16.mxu0 %vm190_vm1, %v2327_v3 }
  0x4c   :  { %2122 = vmatprep.subr.bf16.mxu1 %v2579_v0  ;;  %2136 = vmatprep.subr.bf16.mxu0 %v2579_v0 }
  0x4e   :  { %2113 = vmatmul.mubr.msk.bf16.vlgmr.msra.gmra.mxu0 %vm190_vm1, %v2328_v4  ;;  %2123 = vmatpush3.bf16.msra.mxu1 %v2685_v5 }
  0x4f   :  { %2137 = vmatpush3.bf16.msra.mxu0 %v2680_v2  ;;  %2128 = vmatprep.subr.bf16.mxu1 %v2579_v0 }
  0x50   :  { %2138 = vmatprep.subr.bf16.mxu0 %v2579_v0  ;;  %2116 = vmatprep.mubr.msk.bf16.mxu0 %vm190_vm1, %v2330_v51 }
  0x51   :  { %2125 = vmatmul.mubr.bf16.vlgmr.msra.gmra.mxu1 %v2581_v6 }
  0x52   :  { %2129 = vmatpush3.bf16.msra.mxu1 %v2680_v2  ;;  %2132 = vmatprep.mubr.msk.bf16.mxu1 %vm2580_vm0, %v2579_v0 }
  0x53   :  { %2130 = vmatprep.subr.bf16.mxu1 %v2579_v0  ;;  %2139 = vmatpush3.bf16.msra.mxu0 %v2685_v5 }
  0x54   :  { %2152 = vmatprep.subr.bf16.mxu0 %v2579_v0 }
  0x56   :  { %2131 = vmatpush3.bf16.msra.mxu1 %v2685_v5  ;;  %2117 = vmatmul.mubr.msk.bf16.gmra.mxu0 %vm190_vm1, %v2331_v52 }
  0x57   :  { %2144 = vmatprep.subr.bf16.mxu1 %v2579_v0  ;;  %2140 = vmatprep.mubr.msk.bf16.mxu0 %vm2580_vm0, %v2579_v0 }
 0x10e   :  { %v2701_v7 = vpop.f32.mrf.mxu0 }
 0x10f   :  { %v246_v62 = vadd.f32 %v2701_v7, %v2706_v8 }
 0x110   :  { %v237_v9 = vpop.f32.mrf.mxu0 }
 0x111   :  { %v238_v10 = vadd.f32 %v2706_v8, %v237_v9  ;;  %v327_v11 = vpop.f32.mrf.mxu1 }
 0x112   :  { %v2720_v32 = vpop.f32.mrf.mxu0 }
 0x113   :  { %v333_v12 = vadd.f32 %v327_v11, %v238_v10  ;;  %v2126_v13 = vpop.f32.mrf.mxu1 }
 0x114   :  { %v240_v33 = vpop.f32.mrf.mxu0 }
 0x115   :  { %v1972_v14 = vmul.f32 -1.442695, %v333_v12  ;;  %v330_v15 = vpop.f32.mrf.mxu1  ;;  %v241_v34 = vadd.f32 %v2706_v8, %v240_v33 }
 0x116   :  { %v2738_v58 = vpop.f32.mrf.mxu0 }
 0x117   :  { %2337 = vpow2.f32 %v1972_v14  ;;  %v2127_v16 = vpop.f32.mrf.mxu1 }
 0x118   :  { %v2740_v59 = vpop.f32.mrf.mxu0 }
 0x11a   :  { %v2742_v60 = vpop.f32.mrf.mxu0 }
 0x11c   :  { %v2744_v61 = vpop.f32.mrf.mxu0 }
 0x124   :  { %v2338_v17 = vpop.eup %2337 }
 0x125   :  { %v337_v18 = vadd.f32 1.0, %v2338_v17 }
 0x127   :  { %2339 = vrcp.f32 %v337_v18 }
 0x134   :  { %v2340_v19 = vpop.eup %2339 }
 0x135   :  { %v340_v20 = vmul.f32 2.0, %v2340_v19  ;;  %v342_v24 = vmul.f32 0.0, %v2340_v19 }
 0x137   :  { %v1973_v21 = vadd.f32 -1.0, %v340_v20 }
 0x139   :  { %344 = vrot.lane.b32.xlu0 %v1973_v21, %s2573_s18 }
 0x1ab   :  { %v345_v22 = vpop.permute.xlu0 %344 }
 0x1ac   :  { %v347_v23 = vmul.f32 %v2340_v19, %v345_v22 }
 0x1ae   :  { %349 = vrot.lane.b32.xlu0 %v347_v23, %s2582_s3 }
 0x220   :  { %v350_v25 = vpop.permute.xlu0 %349 }
 0x221   :  { %v352_v26 = vadd.f32 %v350_v25, %v342_v24  ;;  %v249_v24 = vadd.f32 %v2720_v32, %v2706_v8 }
 0x223   :  { %2341 = vtanh.f32 %v352_v26 }
 0x230   :  { %v2342_v27 = vpop.eup %2341 }
 0x231   :  { %355 = vrot.lane.b32.xlu1 %v2342_v27, %s2573_s18 }
 0x2a3   :  { %v356_v28 = vpop.permute.xlu1 %355 }
 0x2a4   :  { %v358_v29 = vmul.f32 %v2340_v19, %v356_v28 }
 0x2a6   :  { %v359_v30 = vpack.c.bf16 %v358_v29, %v358_v29 }
 0x2a8   :  { %362 = vrot.lane.b32.xlu1 %v359_v30, %s2582_s3 }
 0x31a   :  { %v363_v31 = vpop.permute.xlu1 %362 }
 0x31b   :  { %2133 = vmatmul.mubr.msk.bf16.vlgmr.msra.gmra.mxu1 %vm289_vm2, %v363_v31 }
 0x31c   :  { %2145 = vmatpush3.bf16.msra.mxu1 %v2680_v2  ;;  %2148 = vmatprep.mubr.msk.bf16.mxu1 %vm2580_vm0, %v2579_v0 }
 0x31d   :  { %2146 = vmatprep.subr.bf16.mxu1 %v2579_v0 }
 0x320   :  { %2147 = vmatpush3.bf16.msra.mxu1 %v2685_v5 }
 0x321   :  { %2160 = vmatprep.subr.bf16.mxu1 %v2579_v0 }
 0x3db   :  { %v401_v35 = vpop.f32.mrf.mxu1 }
 0x3dc   :  { %v407_v36 = vadd.f32 %v401_v35, %v241_v34 }
 0x3dd   :  { %v2134_v37 = vpop.f32.mrf.mxu1 }
 0x3de   :  { %v1975_v38 = vmul.f32 -1.442695, %v407_v36 }
 0x3df   :  { %v404_v39 = vpop.f32.mrf.mxu1 }
 0x3e0   :  { %2343 = vpow2.f32 %v1975_v38 }
 0x3e1   :  { %v2135_v40 = vpop.f32.mrf.mxu1 }
 0x3ed   :  { %v2344_v41 = vpop.eup %2343 }
 0x3ee   :  { %v411_v42 = vadd.f32 1.0, %v2344_v41 }
 0x3f0   :  { %2345 = vrcp.f32 %v411_v42 }
 0x3fd   :  { %v2346_v43 = vpop.eup %2345 }
 0x3fe   :  { %v414_v44 = vmul.f32 2.0, %v2346_v43  ;;  %v416_v48 = vmul.f32 %v2346_v43, %v352_v26 }
 0x400   :  { %v1976_v45 = vadd.f32 -1.0, %v414_v44 }
 0x402   :  { %418 = vrot.lane.b32.xlu0 %v1976_v45, %s2573_s18 }
 0x474   :  { %v419_v46 = vpop.permute.xlu0 %418 }
 0x475   :  { %v421_v47 = vmul.f32 %v2346_v43, %v419_v46  ;;  %v254_v46 = vadd.f32 %v2706_v8, %v2740_v59 }
 0x477   :  { %423 = vrot.lane.b32.xlu1 %v421_v47, %s2582_s3 }
 0x4e9   :  { %v424_v49 = vpop.permute.xlu1 %423 }
 0x4ea   :  { %v426_v50 = vadd.f32 %v424_v49, %v416_v48 }
 0x4ec   :  { %2347 = vtanh.f32 %v426_v50 }
 0x4f9   :  { %v2348_v53 = vpop.eup %2347 }
 0x4fa   :  { %429 = vrot.lane.b32.xlu0 %v2348_v53, %s2573_s18 }
 0x56c   :  { %v430_v54 = vpop.permute.xlu0 %429 }
 0x56d   :  { %v432_v55 = vmul.f32 %v2346_v43, %v430_v54 }
 0x56f   :  { %v433_v56 = vpack.c.bf16 %v432_v55, %v432_v55 }
 0x571   :  { %436 = vrot.lane.b32.xlu1 %v433_v56, %s2582_s3 }
 0x5e3   :  { %v437_v57 = vpop.permute.xlu1 %436 }
 0x5e4   :  { %2141 = vmatmul.mubr.msk.bf16.vlgmr.msra.gmra.mxu0 %vm289_vm2, %v437_v57 }
 0x5e5   :  { %2153 = vmatpush3.bf16.msra.mxu0 %v2680_v2  ;;  %2156 = vmatprep.mubr.msk.bf16.mxu0 %vm2580_vm0, %v2579_v0 }
 0x5e6   :  { %2154 = vmatprep.subr.bf16.mxu0 %v2579_v0 }
 0x5e9   :  { %2155 = vmatpush3.bf16.msra.mxu0 %v2685_v5 }
 0x5ea   :  { %2168 = vmatprep.subr.bf16.mxu0 %v2579_v0 }
 0x6a4   :  { %v475_v63 = vpop.f32.mrf.mxu0 }
 0x6a5   :  { %v481_v1 = vadd.f32 %v475_v63, %v246_v62 }
 0x6a6   :  { %v2142_v3 = vpop.f32.mrf.mxu0 }
 0x6a7   :  { %v1978_v4 = vmul.f32 -1.442695, %v481_v1 }
 0x6a8   :  { %v478_v6 = vpop.f32.mrf.mxu0 }
 0x6a9   :  { %2349 = vpow2.f32 %v1978_v4 }
 0x6aa   :  { %v2143_v9 = vpop.f32.mrf.mxu0 }
 0x6b6   :  { %v2350_v10 = vpop.eup %2349 }
 0x6b7   :  { %v485_v11 = vadd.f32 1.0, %v2350_v10 }
 0x6b9   :  { %2351 = vrcp.f32 %v485_v11 }
 0x6c6   :  { %v2352_v12 = vpop.eup %2351 }
 0x6c7   :  { %v488_v13 = vmul.f32 2.0, %v2352_v12  ;;  %v490_v7 = vmul.f32 %v2352_v12, %v426_v50 }
 0x6c9   :  { %v1979_v14 = vadd.f32 -1.0, %v488_v13 }
 0x6cb   :  { %492 = vrot.lane.b32.xlu0 %v1979_v14, %s2573_s18 }
 0x73d   :  { %v493_v15 = vpop.permute.xlu0 %492 }
 0x73e   :  { %v495_v16 = vmul.f32 %v2352_v12, %v493_v15 }
 0x740   :  { %497 = vrot.lane.b32.xlu1 %v495_v16, %s2582_s3 }
 0x7b2   :  { %v498_v17 = vpop.permute.xlu1 %497 }
 0x7b3   :  { %v500_v18 = vadd.f32 %v498_v17, %v490_v7 }
 0x7b5   :  { %2353 = vtanh.f32 %v500_v18 }
 0x7c2   :  { %v2354_v19 = vpop.eup %2353 }
 0x7c3   :  { %503 = vrot.lane.b32.xlu0 %v2354_v19, %s2573_s18 }
 0x835   :  { %v504_v20 = vpop.permute.xlu0 %503 }
 0x836   :  { %v506_v21 = vmul.f32 %v2352_v12, %v504_v20  ;;  %v257_v12 = vadd.f32 %v2706_v8, %v2744_v61 }
 0x838   :  { %v507_v22 = vpack.c.bf16 %v506_v21, %v506_v21 }
 0x83a   :  { %510 = vrot.lane.b32.xlu1 %v507_v22, %s2582_s3 }
 0x8ac   :  { %v511_v23 = vpop.permute.xlu1 %510 }
 0x8ad   :  { %2149 = vmatmul.mubr.msk.bf16.vlgmr.msra.gmra.mxu1 %vm289_vm2, %v511_v23 }
 0x8ae   :  { %2161 = vmatpush3.bf16.msra.mxu1 %v2680_v2  ;;  %2164 = vmatprep.mubr.msk.bf16.mxu1 %vm2580_vm0, %v2579_v0 }
 0x8af   :  { %2162 = vmatprep.subr.bf16.mxu1 %v2579_v0 }
 0x8b2   :  { %2163 = vmatpush3.bf16.msra.mxu1 %v2685_v5 }
 0x8b3   :  { %2176 = vmatprep.subr.bf16.mxu1 %v2579_v0 }
 0x96d   :  { %v549_v25 = vpop.f32.mrf.mxu1 }
 0x96e   :  { %v555_v26 = vadd.f32 %v549_v25, %v249_v24 }
 0x96f   :  { %v2150_v27 = vpop.f32.mrf.mxu1 }
 0x970   :  { %v1981_v28 = vmul.f32 -1.442695, %v555_v26 }
 0x971   :  { %v552_v29 = vpop.f32.mrf.mxu1 }
 0x972   :  { %2355 = vpow2.f32 %v1981_v28 }
 0x973   :  { %v2151_v30 = vpop.f32.mrf.mxu1 }
 0x974   :  { %v262_v30 = vadd.f32 %v2738_v58, %v2706_v8 }
 0x97f   :  { %v2356_v31 = vpop.eup %2355 }
 0x980   :  { %v559_v33 = vadd.f32 1.0, %v2356_v31 }
 0x982   :  { %2357 = vrcp.f32 %v559_v33 }
 0x98f   :  { %v2358_v34 = vpop.eup %2357 }
 0x990   :  { %v562_v35 = vmul.f32 2.0, %v2358_v34  ;;  %v564_v32 = vmul.f32 %v2358_v34, %v500_v18 }
 0x992   :  { %v1982_v36 = vadd.f32 -1.0, %v562_v35 }
 0x994   :  { %566 = vrot.lane.b32.xlu0 %v1982_v36, %s2573_s18 }
 0xa06   :  { %v567_v37 = vpop.permute.xlu0 %566 }
 0xa07   :  { %v569_v38 = vmul.f32 %v2358_v34, %v567_v37 }
 0xa09   :  { %571 = vrot.lane.b32.xlu1 %v569_v38, %s2582_s3 }
 0xa7b   :  { %v572_v39 = vpop.permute.xlu1 %571 }
 0xa7c   :  { %v574_v40 = vadd.f32 %v572_v39, %v564_v32 }
 0xa7e   :  { %2359 = vtanh.f32 %v574_v40 }
 0xa8b   :  { %v2360_v41 = vpop.eup %2359 }
 0xa8c   :  { %577 = vrot.lane.b32.xlu0 %v2360_v41, %s2573_s18 }
 0xafe   :  { %v578_v42 = vpop.permute.xlu0 %577 }
 0xaff   :  { %v580_v43 = vmul.f32 %v2358_v34, %v578_v42 }
 0xb01   :  { %v581_v44 = vpack.c.bf16 %v580_v43, %v580_v43 }
 0xb03   :  { %584 = vrot.lane.b32.xlu1 %v581_v44, %s2582_s3 }
 0xb75   :  { %v585_v45 = vpop.permute.xlu1 %584 }
 0xb76   :  { %2157 = vmatmul.mubr.msk.bf16.vlgmr.msra.gmra.mxu0 %vm289_vm2, %v585_v45 }
 0xb77   :  { %2169 = vmatpush3.bf16.msra.mxu0 %v2680_v2  ;;  %2172 = vmatprep.mubr.msk.bf16.mxu0 %vm2580_vm0, %v2579_v0 }
 0xb78   :  { %2170 = vmatprep.subr.bf16.mxu0 %v2579_v0 }
 0xb7b   :  { %2171 = vmatpush3.bf16.msra.mxu0 %v2685_v5 }
 0xb7c   :  { %2184 = vmatprep.subr.bf16.mxu0 %v2579_v0 }
 0xc36   :  { %v623_v47 = vpop.f32.mrf.mxu0 }
 0xc37   :  { %v629_v48 = vadd.f32 %v623_v47, %v254_v46 }
 0xc38   :  { %v2158_v49 = vpop.f32.mrf.mxu0 }
 0xc39   :  { %v1984_v50 = vmul.f32 -1.442695, %v629_v48 }
 0xc3a   :  { %v626_v51 = vpop.f32.mrf.mxu0 }
 0xc3b   :  { %2361 = vpow2.f32 %v1984_v50  ;;  %v265_v51 = vadd.f32 %v2742_v60, %v2706_v8 }
 0xc3c   :  { %v2159_v52 = vpop.f32.mrf.mxu0 }
 0xc48   :  { %v2362_v53 = vpop.eup %2361 }
 0xc49   :  { %v633_v54 = vadd.f32 1.0, %v2362_v53 }
 0xc4b   :  { %2363 = vrcp.f32 %v633_v54 }
 0xc58   :  { %v2364_v55 = vpop.eup %2363 }
 0xc59   :  { %v636_v56 = vmul.f32 2.0, %v2364_v55  ;;  %v638_v59 = vmul.f32 %v2364_v55, %v574_v40 }
 0xc5b   :  { %v1985_v57 = vadd.f32 -1.0, %v636_v56 }
 0xc5d   :  { %640 = vrot.lane.b32.xlu0 %v1985_v57, %s2573_s18 }
 0xccf   :  { %v641_v62 = vpop.permute.xlu0 %640 }
 0xcd0   :  { %v643_v63 = vmul.f32 %v2364_v55, %v641_v62 }
 0xcd2   :  { %645 = vrot.lane.b32.xlu1 %v643_v63, %s2582_s3 }
 0xd44   :  { %v646_v1 = vpop.permute.xlu1 %645 }
 0xd45   :  { %v648_v3 = vadd.f32 %v646_v1, %v638_v59 }
 0xd47   :  { %2365 = vtanh.f32 %v648_v3 }
 0xd54   :  { %v2366_v4 = vpop.eup %2365 }
 0xd55   :  { %651 = vrot.lane.b32.xlu0 %v2366_v4, %s2573_s18 }
 0xdc7   :  { %v652_v6 = vpop.permute.xlu0 %651 }
 0xdc8   :  { %v654_v9 = vmul.f32 %v2364_v55, %v652_v6 }
 0xdca   :  { %v655_v10 = vpack.c.bf16 %v654_v9, %v654_v9 }
 0xdcc   :  { %658 = vrot.lane.b32.xlu1 %v655_v10, %s2582_s3  ;;  %v2807_v10 = vld [vmem:[#allocation11 + $0x8] sm:$0xff]  }
 0xe3e   :  { %v659_v11 = vpop.permute.xlu1 %658 }
 0xe3f   :  { %2165 = vmatmul.mubr.msk.bf16.vlgmr.msra.gmra.mxu1 %vm289_vm2, %v659_v11  ;;  %v2810_v11 = vld [vmem:[#allocation11] sm:$0xff]  }
 0xe40   :  { %2177 = vmatpush3.bf16.msra.mxu1 %v2680_v2  ;;  %2180 = vmatprep.mubr.msk.bf16.mxu1 %vm2580_vm0, %v2579_v0 }
 0xe41   :  { %2178 = vmatprep.subr.bf16.mxu1 %v2579_v0 }
 0xe44   :  { %2179 = vmatpush3.bf16.msra.mxu1 %v2685_v5 }
 0xe45   :  { %2192 = vmatprep.subr.bf16.mxu1 %v2579_v0 }
 0xeff   :  { %v697_v13 = vpop.f32.mrf.mxu1 }
 0xf00   :  { %v703_v14 = vadd.f32 %v697_v13, %v257_v12 }
 0xf01   :  { %v2166_v15 = vpop.f32.mrf.mxu1 }
 0xf02   :  { %v1987_v16 = vmul.f32 -1.442695, %v703_v14 }
 0xf03   :  { %v700_v7 = vpop.f32.mrf.mxu1 }
 0xf04   :  { %2367 = vpow2.f32 %v1987_v16  ;;  %v1995_v7 = vld [vmem:[%s3016_s5] ss:$0 sm:$0xff] }
 0xf05   :  { %v2167_v17 = vpop.f32.mrf.mxu1 }
 0xf06   :  { %v2830_v17 = vld [vmem:[%s3018_s7] ss:$0 sm:$0xff] }
 0xf11   :  { %v2368_v2 = vpop.eup %2367 }
 0xf12   :  { %v707_v18 = vadd.f32 1.0, %v2368_v2 }
 0xf14   :  { %2369 = vrcp.f32 %v707_v18 }
 0xf21   :  { %v2370_v19 = vpop.eup %2369 }
 0xf22   :  { %v710_v20 = vmul.f32 2.0, %v2370_v19  ;;  %v712_v61 = vmul.f32 %v2370_v19, %v648_v3 }
 0xf24   :  { %v1988_v21 = vadd.f32 -1.0, %v710_v20 }
 0xf26   :  { %714 = vrot.lane.b32.xlu0 %v1988_v21, %s2573_s18 }
 0xf98   :  { %v715_v5 = vpop.permute.xlu0 %714 }
 0xf99   :  { %v717_v22 = vmul.f32 %v2370_v19, %v715_v5 }
 0xf9b   :  { %719 = vrot.lane.b32.xlu1 %v717_v22, %s2582_s3 }
0x100d   :  { %v720_v23 = vpop.permute.xlu1 %719 }
0x100e   :  { %v722_v24 = vadd.f32 %v720_v23, %v712_v61 }
0x1010   :  { %2371 = vtanh.f32 %v722_v24 }
0x101d   :  { %v2372_v25 = vpop.eup %2371 }
0x101e   :  { %725 = vrot.lane.b32.xlu0 %v2372_v25, %s2573_s18 }
0x1090   :  { %v726_v26 = vpop.permute.xlu0 %725 }
0x1091   :  { %v728_v27 = vmul.f32 %v2370_v19, %v726_v26 }
0x1093   :  { %v729_v28 = vpack.c.bf16 %v728_v27, %v728_v27 }
0x1095   :  { %732 = vrot.lane.b32.xlu1 %v729_v28, %s2582_s3 }
0x1107   :  { %v733_v29 = vpop.permute.xlu1 %732 }
0x1108   :  { %2173 = vmatmul.mubr.msk.bf16.vlgmr.msra.gmra.mxu0 %vm289_vm2, %v733_v29 }
0x1109   :  { %2188 = vmatprep.mubr.msk.bf16.mxu0 %vm2580_vm0, %v2579_v0  ;;  %2185 = vmatpush3.bf16.msra.mxu0 %v2807_v10 }
0x110a   :  { %2186 = vmatprep.subr.bf16.mxu0 %v2579_v0 }
0x110d   :  { %2187 = vmatpush3.bf16.msra.mxu0 %v2810_v11 }
0x110e   :  { %2200 = vmatprep.subr.bf16.mxu0 %v2579_v0 }
0x11c8   :  { %v771_v31 = vpop.f32.mrf.mxu0 }
0x11c9   :  { %v777_v33 = vadd.f32 %v771_v31, %v262_v30 }
0x11ca   :  { %v2174_v34 = vpop.f32.mrf.mxu0 }
0x11cb   :  { %v1990_v35 = vmul.f32 -1.442695, %v777_v33  ;;  %v2838_v33 = vld [vmem:[#allocation12 + $0x8] sm:$0xff]   ;;  %v2841_v34 = vld [vmem:[#allocation12] sm:$0xff]  }
0x11cc   :  { %v774_v36 = vpop.f32.mrf.mxu0 }
0x11cd   :  { %2373 = vpow2.f32 %v1990_v35 }
0x11ce   :  { %v2175_v37 = vpop.f32.mrf.mxu0 }
0x11da   :  { %v2374_v38 = vpop.eup %2373 }
0x11db   :  { %v781_v32 = vadd.f32 1.0, %v2374_v38 }
0x11dd   :  { %2375 = vrcp.f32 %v781_v32 }
0x11ea   :  { %v2376_v39 = vpop.eup %2375 }
0x11eb   :  { %v784_v40 = vmul.f32 2.0, %v2376_v39  ;;  %v786_v58 = vmul.f32 %v2376_v39, %v722_v24 }
0x11ed   :  { %v1991_v41 = vadd.f32 -1.0, %v784_v40 }
0x11ef   :  { %788 = vrot.lane.b32.xlu0 %v1991_v41, %s2573_s18 }
0x1261   :  { %v789_v42 = vpop.permute.xlu0 %788 }
0x1262   :  { %v791_v43 = vmul.f32 %v2376_v39, %v789_v42 }
0x1264   :  { %793 = vrot.lane.b32.xlu1 %v791_v43, %s2582_s3 }
0x12d6   :  { %v794_v44 = vpop.permute.xlu1 %793 }
0x12d7   :  { %v796_v45 = vadd.f32 %v794_v44, %v786_v58 }
0x12d9   :  { %2377 = vtanh.f32 %v796_v45 }
0x12e6   :  { %v2378_v46 = vpop.eup %2377 }
0x12e7   :  { %799 = vrot.lane.b32.xlu0 %v2378_v46, %s2573_s18 }
0x1359   :  { %v800_v47 = vpop.permute.xlu0 %799 }
0x135a   :  { %v802_v48 = vmul.f32 %v2376_v39, %v800_v47  ;;  %v2861_v39 = vld [vmem:[%s3020_s9] ss:$0 sm:$0xff]  ;;  %s2583_s9 = smov [#allocation14]  }
0x135b   :  { %s1943_s26 = sshll.u32 %s2583_s9, 4  ;;  %s1944_s26 = int_to_ptr.vmem [resolvable:$true] %s1943_s26 }
0x135c   :  { %v803_v49 = vpack.c.bf16 %v802_v48, %v802_v48  ;;  %v878_v48 = vlaneseq  ;;  %s2541_s27 = scalar_lea.vmem %s1944_s26, 768  ;;  %p2546_p3 = scmp.lt.s32.totalorder %s1944_s26, %s1944_s26 }
0x135d   :  { %p2542_p2 = scmp.ne.s32.totalorder %s1944_s26, %s2541_s27  ;;  %p2547_p4 = scmp.lt.s32.totalorder %s2541_s27, %s2541_s27 }
0x135e   :  { %806 = vrot.lane.b32.xlu1 %v803_v49, %s2582_s3  ;;  %v2864_v49 = vand.u32 127, %v878_v48 }
0x135f   :  { %p2548_p5 = por %p2547_p4, %p2546_p3 }
0x1361   :  { %p2549_p6 = pnand %p2548_p5, %p2542_p2 }
0x13d0   :  { %v807_v50 = vpop.permute.xlu1 %806 }
0x13d1   :  { %2181 = vmatmul.mubr.msk.bf16.vlgmr.msra.gmra.mxu1 %vm289_vm2, %v807_v50 }
0x13d2   :  { %2196 = vmatprep.mubr.msk.bf16.mxu1 %vm2580_vm0, %v2579_v0  ;;  %2193 = vmatpush3.bf16.msra.mxu1 %v2838_v33 }
0x13d3   :  { %2194 = vmatprep.subr.bf16.mxu1 %v2579_v0 }
0x13d6   :  { %2195 = vmatpush3.bf16.msra.mxu1 %v2841_v34 }
0x13d7   :  { %2208 = vmatprep.subr.bf16.mxu1 %v2579_v0 }
0x1491   :  { %v845_v52 = vpop.f32.mrf.mxu1 }
0x1492   :  { %v851_v53 = vadd.f32 %v845_v52, %v265_v51 }
0x1493   :  { %v2182_v54 = vpop.f32.mrf.mxu1 }
0x1494   :  { %v1993_v55 = vmul.f32 -1.442695, %v851_v53 }
0x1495   :  { %v848_v56 = vpop.f32.mrf.mxu1 }
0x1496   :  { %2379 = vpow2.f32 %v1993_v55 }
0x1497   :  { %v2183_v57 = vpop.f32.mrf.mxu1 }
0x14a3   :  { %v2380_v62 = vpop.eup %2379 }
0x14a4   :  { %v855_v63 = vadd.f32 1.0, %v2380_v62  ;;  %v2867_v62 = vld [vmem:[#allocation9] sm:$0xff]  }
0x14a6   :  { %2381 = vrcp.f32 %v855_v63 }
0x14b3   :  { %v2382_v59 = vpop.eup %2381 }
0x14b4   :  { %v858_v1 = vmul.f32 2.0, %v2382_v59  ;;  %v860_v8 = vmul.f32 %v2382_v59, %v796_v45 }
0x14b6   :  { %v1994_v3 = vadd.f32 -1.0, %v858_v1 }
0x14b8   :  { %862 = vrot.lane.b32.xlu0 %v1994_v3, %s2573_s18 }
0x152a   :  { %v863_v4 = vpop.permute.xlu0 %862 }
0x152b   :  { %v865_v6 = vmul.f32 %v2382_v59, %v863_v4 }
0x152d   :  { %867 = vrot.lane.b32.xlu1 %v865_v6, %s2582_s3 }
0x159f   :  { %v868_v60 = vpop.permute.xlu1 %867 }
0x15a0   :  { %v870_v9 = vadd.f32 %v868_v60, %v860_v8 }
0x15a2   :  { %2383 = vtanh.f32 %v870_v9 }
0x15af   :  { %v2384_v12 = vpop.eup %2383 }
0x15b0   :  { %873 = vrot.lane.b32.xlu0 %v2384_v12, %s2573_s18 }
0x1622   :  { %v874_v13 = vpop.permute.xlu0 %873 }
0x1623   :  { %v876_v14 = vmul.f32 %v2382_v59, %v874_v13 }
0x1625   :  { %v877_v15 = vpack.c.bf16 %v876_v14, %v876_v14 }
0x1627   :  { %888 = vrot.lane.b32.xlu1 %v877_v15, %s2582_s3 }
0x1699   :  { %v889_v16 = vpop.permute.xlu1 %888 }
0x169a   :  { %2189 = vmatmul.mubr.msk.bf16.vlgmr.msra.gmra.mxu0 %vm289_vm2, %v889_v16 }
0x169b   :  { %2201 = vmatpush3.bf16.msra.mxu0 %v2807_v10  ;;  %2204 = vmatprep.mubr.msk.bf16.mxu0 %vm2580_vm0, %v2579_v0 }
0x169c   :  { %2202 = vmatprep.subr.bf16.mxu0 %v2579_v0 }
0x169f   :  { %2203 = vmatpush3.bf16.msra.mxu0 %v2810_v11 }
0x16a0   :  { %2214 = vmatprep.subr.bf16.mxu0 %v2579_v0 }
0x175a   :  { %v939_v2 = vpop.f32.mrf.mxu0 }
0x175b   :  { %v945_v18 = vadd.f32 %v1995_v7, %v939_v2 }
0x175c   :  { %v2190_v19 = vpop.f32.mrf.mxu0 }
0x175d   :  { %v946_v20 = vadd.f32 %v2830_v17, %v945_v18 }
0x175e   :  { %v942_v21 = vpop.f32.mrf.mxu0 }
0x175f   :  { %v1999_v5 = vmul.f32 -1.442695, %v946_v20 }
0x1760   :  { %v2191_v22 = vpop.f32.mrf.mxu0 }
0x1761   :  { %2385 = vpow2.f32 %v1999_v5 }
0x176e   :  { %v2386_v61 = vpop.eup %2385 }
0x176f   :  { %v950_v23 = vadd.f32 1.0, %v2386_v61 }
0x1771   :  { %2387 = vrcp.f32 %v950_v23 }
0x177e   :  { %v2388_v24 = vpop.eup %2387 }
0x177f   :  { %v953_v25 = vmul.f32 2.0, %v2388_v24  ;;  %v955_v29 = vmul.f32 %v2388_v24, %v870_v9 }
0x1781   :  { %v2000_v26 = vadd.f32 -1.0, %v953_v25 }
0x1783   :  { %957 = vrot.lane.b32.xlu0 %v2000_v26, %s2573_s18 }
0x17f5   :  { %v958_v27 = vpop.permute.xlu0 %957 }
0x17f6   :  { %v960_v28 = vmul.f32 %v2388_v24, %v958_v27 }
0x17f8   :  { %962 = vrot.lane.b32.xlu1 %v960_v28, %s2582_s3 }
0x186a   :  { %v963_v30 = vpop.permute.xlu1 %962 }
0x186b   :  { %v2835_v31 = vadd.f32 %v963_v30, %v955_v29 }
0x186d   :  { %2389 = vtanh.f32 %v2835_v31 }
0x187a   :  { %v2390_v35 = vpop.eup %2389 }
0x187b   :  { %968 = vrot.lane.b32.xlu0 %v2390_v35, %s2573_s18 }
0x18ed   :  { %v969_v36 = vpop.permute.xlu0 %968 }
0x18ee   :  { %v971_v37 = vmul.f32 %v2388_v24, %v969_v36 }
0x18f0   :  { %v972_v38 = vpack.c.bf16 %v971_v37, %v971_v37 }
0x18f2   :  { %974 = vrot.lane.b32.xlu1 %v972_v38, %s2582_s3 }
0x1964   :  { %v975_v32 = vpop.permute.xlu1 %974 }
0x1965   :  { %2197 = vmatmul.mubr.msk.bf16.vlgmr.msra.gmra.mxu1 %vm289_vm2, %v975_v32  ;;  %2205 = vmatmul.mubr.msk.bf16.vlgmr.msra.gmra.mxu0 %vm289_vm2, %v975_v32 }
0x1966   :  { %2210 = vmatprep.mubr.msk.bf16.mxu1 %vm2580_vm0, %v2579_v0  ;;  %2215 = vmatpush3.bf16.msra.mxu0 %v2838_v33 }
0x1967   :  { %2216 = vmatprep.subr.bf16.mxu0 %v2579_v0  ;;  %2218 = vmatprep.mubr.msk.bf16.mxu0 %vm2580_vm0, %v2579_v0 }
0x1968   :  { %2209 = vmatpush3.bf16.msra.mxu1 %v2867_v62 }
0x1969   :  { %2222 = vmatprep.subr.bf16.mxu1 %v2579_v0 }
0x196a   :  { %2217 = vmatpush3.bf16.msra.mxu0 %v2841_v34 }
0x196b   :  { %2230 = vmatprep.subr.bf16.mxu0 %v2579_v0 }
0x1a25   :  { %v1025_v40 = vpop.f32.mrf.mxu1  ;;  %v1088_v41 = vpop.f32.mrf.mxu0 }
0x1a26   :  { %v1026_v42 = vadd.f32 %v2861_v39, %v1025_v40 }
0x1a27   :  { %v2198_v43 = vpop.f32.mrf.mxu1  ;;  %v2206_v58 = vpop.f32.mrf.mxu0 }
0x1a28   :  { %1031 = vst [vmem:[#allocation14] sm:$0xff] %v1026_v42  ;;  %1032 = vmax.xlane.f32.xlu0 %v1026_v42 }
0x1a29   :  { %v1028_v44 = vpop.f32.mrf.mxu1  ;;  %v1091_v45 = vpop.f32.mrf.mxu0 }
0x1a2b   :  { %v2199_v46 = vpop.f32.mrf.mxu1  ;;  %v2207_v47 = vpop.f32.mrf.mxu0 }
0x1ab1   :  { %v1033_v50 = vpop.xlane.xlu0 %1032 }
0x1ab2   :  { %vm1034_vm3 = vcmp.eq.f32.partialorder %v1026_v42, %v1033_v50 }
0x1ab3   :  { %v1035_v51 = vsel %vm1034_vm3, %v2864_v49, 128 }
0x1ab4   :  { %v1037_v52 = vshra.s32 %v1035_v51, 16  ;;  %v1036_v54 = vand.u32 65535, %v1035_v51 }
0x1ab6   :  { %v1039_v53 = vcvt.s32.f32 %v1037_v52  ;;  %v1038_v56 = vcvt.s32.f32 %v1036_v54 }
0x1ab8   :  { %1040 = vmin.xlane.f32.xlu1 %v1039_v53 }
0x1b41   :  { %v1041_v55 = vpop.xlane.xlu1 %1040 }
0x1b42   :  { %vm1042_vm4 = vcmp.eq.f32.partialorder %v1039_v53, %v1041_v55  ;;  %v1047_v63 = vcvt.f32.s32 %v1041_v55 }
0x1b43   :  { %v1043_v57 = vsel %vm1042_vm4, %v1038_v56, inf }
0x1b44   :  { %1044 = vmin.xlane.f32.xlu0 %v1043_v57  ;;  %v1048_v1 = vshll.u32 %v1047_v63, 16 }
0x1bcd   :  { %v1045_v59 = vpop.xlane.xlu0 %1044 }
0x1bce   :  { %v1046_v3 = vcvt.f32.s32 %v1045_v59 }
0x1bd0   :  { %v1049_v4 = vadd.s32 %v1048_v1, %v1046_v3 }
0x1bd2   :  { %vm1050_vm5 = vcmp.eq.s32.totalorder %v2864_v49, %v1049_v4 }
0x1bd3   :  { %v2004_v6 = vsel %vm1050_vm5, 1.0, %v2579_v0 }
0x1bd4   :  { %v1053_v8 = vpack.c.bf16 %v2004_v6, %v2004_v6 }
0x1bd6   :  { %2211 = vmatmul.mubr.msk.bf16.vlgmr.msra.gmra.mxu1 %vm190_vm1, %v1053_v8 }
0x1bd7   :  { %2223 = vmatpush3.bf16.msra.mxu1 %v2807_v10  ;;  %2226 = vmatprep.mubr.msk.bf16.mxu1 %vm2580_vm0, %v2579_v0 }
0x1bd8   :  { %2224 = vmatprep.subr.bf16.mxu1 %v2579_v0 }
0x1bdb   :  { %2225 = vmatpush3.bf16.msra.mxu1 %v2810_v11 }
0x1bdc   :  { %2236 = vmatprep.subr.bf16.mxu1 %v2579_v0 }
0x1c96   :  { %v1137_v60 = vpop.f32.mrf.mxu1 }
0x1c97   :  { %v1138_v9 = vadd.f32 %v1137_v60, %v1088_v41 }
0x1c98   :  { %v2212_v12 = vpop.f32.mrf.mxu1 }
0x1c99   :  { %v1143_v13 = vadd.f32 %v2830_v17, %v1138_v9 }
0x1c9a   :  { %v1140_v14 = vpop.f32.mrf.mxu1 }
0x1c9b   :  { %v2008_v15 = vmul.f32 -1.442695, %v1143_v13 }
0x1c9c   :  { %v2213_v16 = vpop.f32.mrf.mxu1 }
0x1c9d   :  { %2391 = vpow2.f32 %v2008_v15 }
0x1caa   :  { %v2392_v7 = vpop.eup %2391 }
0x1cab   :  { %v1147_v2 = vadd.f32 1.0, %v2392_v7 }
0x1cad   :  { %2393 = vrcp.f32 %v1147_v2 }
0x1cba   :  { %v2394_v18 = vpop.eup %2393 }
0x1cbb   :  { %v1150_v19 = vmul.f32 2.0, %v2394_v18  ;;  %v1152_v22 = vmul.f32 %v2394_v18, %v2835_v31 }
0x1cbd   :  { %v2009_v20 = vadd.f32 -1.0, %v1150_v19 }
0x1cbf   :  { %1154 = vrot.lane.b32.xlu0 %v2009_v20, %s2573_s18 }
0x1d31   :  { %v1155_v21 = vpop.permute.xlu0 %1154 }
0x1d32   :  { %v1157_v5 = vmul.f32 %v2394_v18, %v1155_v21 }
0x1d34   :  { %1159 = vrot.lane.b32.xlu1 %v1157_v5, %s2582_s3 }
0x1da6   :  { %v1160_v61 = vpop.permute.xlu1 %1159 }
0x1da7   :  { %v2884_v23 = vadd.f32 %v1160_v61, %v1152_v22 }
0x1da9   :  { %2395 = vtanh.f32 %v2884_v23 }
0x1db6   :  { %v2396_v24 = vpop.eup %2395 }
0x1db7   :  { %1165 = vrot.lane.b32.xlu1 %v2396_v24, %s2573_s18 }
0x1e29   :  { %v1166_v25 = vpop.permute.xlu1 %1165 }
0x1e2a   :  { %v1168_v26 = vmul.f32 %v2394_v18, %v1166_v25 }
0x1e2c   :  { %v1169_v27 = vpack.c.bf16 %v1168_v26, %v1168_v26 }
0x1e2e   :  { %1171 = vrot.lane.b32.xlu0 %v1169_v27, %s2582_s3 }
0x1ea0   :  { %v1172_v28 = vpop.permute.xlu0 %1171 }
0x1ea1   :  { %2219 = vmatmul.mubr.msk.bf16.vlgmr.msra.gmra.mxu0 %vm289_vm2, %v1172_v28  ;;  %2227 = vmatmul.mubr.msk.bf16.vlgmr.msra.gmra.mxu1 %vm289_vm2, %v1172_v28 }
0x1ea2   :  { %2231 = vmatpush3.bf16.msra.mxu0 %v2867_v62  ;;  %2232 = vmatprep.mubr.msk.bf16.mxu0 %vm2580_vm0, %v2579_v0 }
0x1ea3   :  { %2237 = vmatpush3.bf16.msra.mxu1 %v2838_v33  ;;  %2244 = vmatprep.subr.bf16.mxu0 %v2579_v0 }
0x1ea4   :  { %2238 = vmatprep.subr.bf16.mxu1 %v2579_v0  ;;  %2240 = vmatprep.mubr.msk.bf16.mxu1 %vm2580_vm0, %v2579_v0 }
0x1ea7   :  { %2239 = vmatpush3.bf16.msra.mxu1 %v2841_v34 }
0x1ea8   :  { %2252 = vmatprep.subr.bf16.mxu1 %v2579_v0 }
0x1f61   :  { %v1210_v29 = vpop.f32.mrf.mxu0  ;;  %v1274_v30 = vpop.f32.mrf.mxu1 }
0x1f62   :  { %v1211_v31 = vadd.f32 %v2861_v39, %v1210_v29 }
0x1f63   :  { %v2220_v35 = vpop.f32.mrf.mxu0  ;;  %v2228_v36 = vpop.f32.mrf.mxu1 }
0x1f64   :  { %1217 = vst [vmem:[#allocation14 + $0x8] sm:$0xff] %v1211_v31  ;;  %1218 = vmax.xlane.f32.xlu1 %v1211_v31 }
0x1f65   :  { %v1213_v37 = vpop.f32.mrf.mxu0  ;;  %v1277_v38 = vpop.f32.mrf.mxu1 }
0x1f67   :  { %v2221_v32 = vpop.f32.mrf.mxu0  ;;  %v2229_v40 = vpop.f32.mrf.mxu1 }
0x1fed   :  { %v1219_v41 = vpop.xlane.xlu1 %1218 }
0x1fee   :  { %vm1220_vm6 = vcmp.eq.f32.partialorder %v1211_v31, %v1219_v41 }
0x1fef   :  { %v1221_v42 = vsel %vm1220_vm6, %v2864_v49, 128 }
0x1ff0   :  { %v1223_v43 = vshra.s32 %v1221_v42, 16  ;;  %v1222_v44 = vand.u32 65535, %v1221_v42 }
0x1ff2   :  { %v1225_v58 = vcvt.s32.f32 %v1223_v43  ;;  %v1224_v46 = vcvt.s32.f32 %v1222_v44 }
0x1ff4   :  { %1226 = vmin.xlane.f32.xlu0 %v1225_v58 }
0x207d   :  { %v1227_v45 = vpop.xlane.xlu0 %1226 }
0x207e   :  { %vm1228_vm7 = vcmp.eq.f32.partialorder %v1225_v58, %v1227_v45  ;;  %v1233_v48 = vcvt.f32.s32 %v1227_v45 }
0x207f   :  { %v1229_v47 = vsel %vm1228_vm7, %v1224_v46, inf }
0x2080   :  { %1230 = vmin.xlane.f32.xlu0 %v1229_v47  ;;  %v1234_v51 = vshll.u32 %v1233_v48, 16 }
0x2109   :  { %v1231_v50 = vpop.xlane.xlu0 %1230 }
0x210a   :  { %v1232_v52 = vcvt.f32.s32 %v1231_v50 }
0x210c   :  { %v1235_v53 = vadd.s32 %v1234_v51, %v1232_v52 }
0x210e   :  { %vm1236_vm8 = vcmp.eq.s32.totalorder %v2864_v49, %v1235_v53 }
0x210f   :  { %v2011_v54 = vsel %vm1236_vm8, 1.0, %v2579_v0 }
0x2110   :  { %v1239_v55 = vpack.c.bf16 %v2011_v54, %v2011_v54 }
0x2112   :  { %2233 = vmatmul.mubr.msk.bf16.vlgmr.msra.gmra.mxu0 %vm190_vm1, %v1239_v55 }
0x2113   :  { %2245 = vmatpush3.bf16.msra.mxu0 %v2807_v10  ;;  %2248 = vmatprep.mubr.msk.bf16.mxu0 %vm2580_vm0, %v2579_v0 }
0x2114   :  { %2246 = vmatprep.subr.bf16.mxu0 %v2579_v0 }
0x2117   :  { %2247 = vmatpush3.bf16.msra.mxu0 %v2810_v11 }
0x2118   :  { %2258 = vmatprep.subr.bf16.mxu0 %v2579_v0 }
0x21d2   :  { %v1317_v56 = vpop.f32.mrf.mxu0 }
0x21d3   :  { %v1318_v57 = vadd.f32 %v1317_v56, %v1274_v30 }
0x21d4   :  { %v2234_v63 = vpop.f32.mrf.mxu0 }
0x21d5   :  { %v1323_v59 = vadd.f32 %v2830_v17, %v1318_v57 }
0x21d6   :  { %v1320_v1 = vpop.f32.mrf.mxu0 }
0x21d7   :  { %v2014_v3 = vmul.f32 -1.442695, %v1323_v59 }
0x21d8   :  { %v2235_v4 = vpop.f32.mrf.mxu0 }
0x21d9   :  { %2397 = vpow2.f32 %v2014_v3 }
0x21e6   :  { %v2398_v6 = vpop.eup %2397 }
0x21e7   :  { %v1327_v8 = vadd.f32 1.0, %v2398_v6 }
0x21e9   :  { %2399 = vrcp.f32 %v1327_v8 }
0x21f6   :  { %v2400_v60 = vpop.eup %2399 }
0x21f7   :  { %v1330_v9 = vmul.f32 2.0, %v2400_v60  ;;  %v1332_v15 = vmul.f32 %v2400_v60, %v2884_v23 }
0x21f9   :  { %v2015_v12 = vadd.f32 -1.0, %v1330_v9 }
0x21fb   :  { %1334 = vrot.lane.b32.xlu1 %v2015_v12, %s2573_s18 }
0x226d   :  { %v1335_v13 = vpop.permute.xlu1 %1334 }
0x226e   :  { %v1337_v14 = vmul.f32 %v2400_v60, %v1335_v13 }
0x2270   :  { %1339 = vrot.lane.b32.xlu0 %v1337_v14, %s2582_s3 }
0x22e2   :  { %v1340_v16 = vpop.permute.xlu0 %1339 }
0x22e3   :  { %v2916_v7 = vadd.f32 %v1340_v16, %v1332_v15 }
0x22e5   :  { %2401 = vtanh.f32 %v2916_v7 }
0x22f2   :  { %v2402_v2 = vpop.eup %2401 }
0x22f3   :  { %1345 = vrot.lane.b32.xlu1 %v2402_v2, %s2573_s18 }
0x2365   :  { %v1346_v18 = vpop.permute.xlu1 %1345 }
0x2366   :  { %v1348_v19 = vmul.f32 %v2400_v60, %v1346_v18 }
0x2368   :  { %v1349_v20 = vpack.c.bf16 %v1348_v19, %v1348_v19 }
0x236a   :  { %1351 = vrot.lane.b32.xlu1 %v1349_v20, %s2582_s3 }
0x23dc   :  { %v1352_v21 = vpop.permute.xlu1 %1351 }
0x23dd   :  { %2241 = vmatmul.mubr.msk.bf16.vlgmr.msra.gmra.mxu1 %vm289_vm2, %v1352_v21  ;;  %2249 = vmatmul.mubr.msk.bf16.vlgmr.msra.gmra.mxu0 %vm289_vm2, %v1352_v21 }
0x23de   :  { %2253 = vmatpush3.bf16.msra.mxu1 %v2867_v62  ;;  %2254 = vmatprep.mubr.msk.bf16.mxu1 %vm2580_vm0, %v2579_v0 }
0x23df   :  { %2259 = vmatpush3.bf16.msra.mxu0 %v2838_v33  ;;  %2266 = vmatprep.subr.bf16.mxu1 %v2579_v0 }
0x23e0   :  { %2260 = vmatprep.subr.bf16.mxu0 %v2579_v0  ;;  %2262 = vmatprep.mubr.msk.bf16.mxu0 %vm2580_vm0, %v2579_v0 }
0x23e3   :  { %2261 = vmatpush3.bf16.msra.mxu0 %v2841_v34 }
0x23e4   :  { %2274 = vmatprep.subr.bf16.mxu0 %v2579_v0 }
0x249d   :  { %v1390_v5 = vpop.f32.mrf.mxu1  ;;  %v1454_v22 = vpop.f32.mrf.mxu0 }
0x249e   :  { %v1391_v61 = vadd.f32 %v2861_v39, %v1390_v5 }
0x249f   :  { %v2242_v23 = vpop.f32.mrf.mxu1  ;;  %v2250_v24 = vpop.f32.mrf.mxu0 }
0x24a0   :  { %1397 = vst [vmem:[#allocation14 + $0x10] sm:$0xff] %v1391_v61  ;;  %1398 = vmax.xlane.f32.xlu0 %v1391_v61 }
0x24a1   :  { %v1393_v25 = vpop.f32.mrf.mxu1  ;;  %v1457_v26 = vpop.f32.mrf.mxu0 }
0x24a3   :  { %v2243_v27 = vpop.f32.mrf.mxu1  ;;  %v2251_v28 = vpop.f32.mrf.mxu0 }
0x2529   :  { %v1399_v29 = vpop.xlane.xlu0 %1398 }
0x252a   :  { %vm1400_vm9 = vcmp.eq.f32.partialorder %v1391_v61, %v1399_v29 }
0x252b   :  { %v1401_v30 = vsel %vm1400_vm9, %v2864_v49, 128 }
0x252c   :  { %v1403_v31 = vshra.s32 %v1401_v30, 16  ;;  %v1402_v36 = vand.u32 65535, %v1401_v30 }
0x252e   :  { %v1405_v35 = vcvt.s32.f32 %v1403_v31  ;;  %v1404_v38 = vcvt.s32.f32 %v1402_v36 }
0x2530   :  { %1406 = vmin.xlane.f32.xlu1 %v1405_v35 }
0x25b9   :  { %v1407_v37 = vpop.xlane.xlu1 %1406 }
0x25ba   :  { %vm1408_vm10 = vcmp.eq.f32.partialorder %v1405_v35, %v1407_v37  ;;  %v1413_v40 = vcvt.f32.s32 %v1407_v37 }
0x25bb   :  { %v1409_v32 = vsel %vm1408_vm10, %v1404_v38, inf }
0x25bc   :  { %1410 = vmin.xlane.f32.xlu0 %v1409_v32  ;;  %v1414_v42 = vshll.u32 %v1413_v40, 16 }
0x2645   :  { %v1411_v41 = vpop.xlane.xlu0 %1410 }
0x2646   :  { %v1412_v43 = vcvt.f32.s32 %v1411_v41 }
0x2648   :  { %v1415_v58 = vadd.s32 %v1414_v42, %v1412_v43 }
0x264a   :  { %vm1416_vm11 = vcmp.eq.s32.totalorder %v2864_v49, %v1415_v58 }
0x264b   :  { %v2017_v44 = vsel %vm1416_vm11, 1.0, %v2579_v0 }
0x264c   :  { %v1419_v45 = vpack.c.bf16 %v2017_v44, %v2017_v44 }
0x264e   :  { %2255 = vmatmul.mubr.msk.bf16.vlgmr.msra.gmra.mxu1 %vm190_vm1, %v1419_v45 }
0x264f   :  { %2267 = vmatpush3.bf16.msra.mxu1 %v2807_v10  ;;  %2270 = vmatprep.mubr.msk.bf16.mxu1 %vm2580_vm0, %v2579_v0 }
0x2650   :  { %2268 = vmatprep.subr.bf16.mxu1 %v2579_v0 }
0x2653   :  { %2269 = vmatpush3.bf16.msra.mxu1 %v2810_v11 }
0x2654   :  { %2280 = vmatprep.subr.bf16.mxu1 %v2579_v0 }
0x270e   :  { %v1497_v46 = vpop.f32.mrf.mxu1 }
0x270f   :  { %v1498_v47 = vadd.f32 %v1497_v46, %v1454_v22 }
0x2710   :  { %v2256_v48 = vpop.f32.mrf.mxu1 }
0x2711   :  { %v1503_v50 = vadd.f32 %v2830_v17, %v1498_v47 }
0x2712   :  { %v1500_v51 = vpop.f32.mrf.mxu1 }
0x2713   :  { %v2020_v52 = vmul.f32 -1.442695, %v1503_v50 }
0x2714   :  { %v2257_v53 = vpop.f32.mrf.mxu1 }
0x2715   :  { %2403 = vpow2.f32 %v2020_v52 }
0x2722   :  { %v2404_v54 = vpop.eup %2403 }
0x2723   :  { %v1507_v55 = vadd.f32 1.0, %v2404_v54 }
0x2725   :  { %2405 = vrcp.f32 %v1507_v55 }
0x2732   :  { %v2406_v56 = vpop.eup %2405 }
0x2733   :  { %v1510_v57 = vmul.f32 2.0, %v2406_v56  ;;  %v1512_v3 = vmul.f32 %v2406_v56, %v2916_v7 }
0x2735   :  { %v2021_v63 = vadd.f32 -1.0, %v1510_v57 }
0x2737   :  { %1514 = vrot.lane.b32.xlu0 %v2021_v63, %s2573_s18 }
0x27a9   :  { %v1515_v59 = vpop.permute.xlu0 %1514 }
0x27aa   :  { %v1517_v1 = vmul.f32 %v2406_v56, %v1515_v59 }
0x27ac   :  { %1519 = vrot.lane.b32.xlu1 %v1517_v1, %s2582_s3 }
0x281e   :  { %v1520_v4 = vpop.permute.xlu1 %1519 }
0x281f   :  { %v2948_v6 = vadd.f32 %v1520_v4, %v1512_v3 }
0x2821   :  { %2407 = vtanh.f32 %v2948_v6 }
0x282e   :  { %v2408_v8 = vpop.eup %2407 }
0x282f   :  { %1525 = vrot.lane.b32.xlu1 %v2408_v8, %s2573_s18 }
0x28a1   :  { %v1526_v60 = vpop.permute.xlu1 %1525 }
0x28a2   :  { %v1528_v9 = vmul.f32 %v2406_v56, %v1526_v60 }
0x28a4   :  { %v1529_v12 = vpack.c.bf16 %v1528_v9, %v1528_v9 }
0x28a6   :  { %1531 = vrot.lane.b32.xlu0 %v1529_v12, %s2582_s3 }
0x2918   :  { %v1532_v13 = vpop.permute.xlu0 %1531 }
0x2919   :  { %2263 = vmatmul.mubr.msk.bf16.vlgmr.msra.gmra.mxu0 %vm289_vm2, %v1532_v13  ;;  %2271 = vmatmul.mubr.msk.bf16.vlgmr.msra.gmra.mxu1 %vm289_vm2, %v1532_v13 }
0x291a   :  { %2275 = vmatpush3.bf16.msra.mxu0 %v2867_v62  ;;  %2276 = vmatprep.mubr.msk.bf16.mxu0 %vm2580_vm0, %v2579_v0 }
0x291b   :  { %2281 = vmatpush3.bf16.msra.mxu1 %v2838_v33  ;;  %2288 = vmatprep.subr.bf16.mxu0 %v2579_v0 }
0x291c   :  { %2282 = vmatprep.subr.bf16.mxu1 %v2579_v0  ;;  %2284 = vmatprep.mubr.msk.bf16.mxu1 %vm2580_vm0, %v2579_v0 }
0x291f   :  { %2283 = vmatpush3.bf16.msra.mxu1 %v2841_v34 }
0x2920   :  { %2296 = vmatprep.subr.bf16.mxu1 %v2579_v0 }
0x29d9   :  { %v1570_v14 = vpop.f32.mrf.mxu0  ;;  %v1634_v15 = vpop.f32.mrf.mxu1 }
0x29da   :  { %v1571_v16 = vadd.f32 %v2861_v39, %v1570_v14 }
0x29db   :  { %v2264_v7 = vpop.f32.mrf.mxu0  ;;  %v2272_v2 = vpop.f32.mrf.mxu1 }
0x29dc   :  { %1577 = vst [vmem:[#allocation14 + $0x18] sm:$0xff] %v1571_v16  ;;  %1578 = vmax.xlane.f32.xlu1 %v1571_v16 }
0x29dd   :  { %v1573_v18 = vpop.f32.mrf.mxu0  ;;  %v1637_v19 = vpop.f32.mrf.mxu1 }
0x29df   :  { %v2265_v20 = vpop.f32.mrf.mxu0  ;;  %v2273_v21 = vpop.f32.mrf.mxu1 }
0x2a65   :  { %v1579_v5 = vpop.xlane.xlu1 %1578 }
0x2a66   :  { %vm1580_vm12 = vcmp.eq.f32.partialorder %v1571_v16, %v1579_v5 }
0x2a67   :  { %v1581_v22 = vsel %vm1580_vm12, %v2864_v49, 128 }
0x2a68   :  { %v1583_v61 = vshra.s32 %v1581_v22, 16  ;;  %v1582_v24 = vand.u32 65535, %v1581_v22 }
0x2a6a   :  { %v1585_v23 = vcvt.s32.f32 %v1583_v61  ;;  %v1584_v26 = vcvt.s32.f32 %v1582_v24 }
0x2a6c   :  { %1586 = vmin.xlane.f32.xlu0 %v1585_v23 }
0x2af5   :  { %v1587_v25 = vpop.xlane.xlu0 %1586 }
0x2af6   :  { %vm1588_vm13 = vcmp.eq.f32.partialorder %v1585_v23, %v1587_v25  ;;  %v1593_v28 = vcvt.f32.s32 %v1587_v25 }
0x2af7   :  { %v1589_v27 = vsel %vm1588_vm13, %v1584_v26, inf }
0x2af8   :  { %1590 = vmin.xlane.f32.xlu0 %v1589_v27  ;;  %v1594_v30 = vshll.u32 %v1593_v28, 16 }
0x2b81   :  { %v1591_v29 = vpop.xlane.xlu0 %1590 }
0x2b82   :  { %v1592_v31 = vcvt.f32.s32 %v1591_v29 }
0x2b84   :  { %v1595_v35 = vadd.s32 %v1594_v30, %v1592_v31 }
0x2b86   :  { %vm1596_vm14 = vcmp.eq.s32.totalorder %v2864_v49, %v1595_v35 }
0x2b87   :  { %v2023_v36 = vsel %vm1596_vm14, 1.0, %v2579_v0 }
0x2b88   :  { %v1599_v37 = vpack.c.bf16 %v2023_v36, %v2023_v36 }
0x2b8a   :  { %2277 = vmatmul.mubr.msk.bf16.vlgmr.msra.gmra.mxu0 %vm190_vm1, %v1599_v37 }
0x2b8b   :  { %2289 = vmatpush3.bf16.msra.mxu0 %v2807_v10  ;;  %2292 = vmatprep.mubr.msk.bf16.mxu0 %vm2580_vm0, %v2579_v0 }
0x2b8c   :  { %2290 = vmatprep.subr.bf16.mxu0 %v2579_v0 }
0x2b8f   :  { %2291 = vmatpush3.bf16.msra.mxu0 %v2810_v11 }
0x2b90   :  { %2302 = vmatprep.subr.bf16.mxu0 %v2579_v0 }
0x2c4a   :  { %v1677_v38 = vpop.f32.mrf.mxu0 }
0x2c4b   :  { %v1678_v32 = vadd.f32 %v1677_v38, %v1634_v15 }
0x2c4c   :  { %v2278_v40 = vpop.f32.mrf.mxu0 }
0x2c4d   :  { %v1683_v41 = vadd.f32 %v2830_v17, %v1678_v32 }
0x2c4e   :  { %v1680_v42 = vpop.f32.mrf.mxu0 }
0x2c4f   :  { %v2026_v43 = vmul.f32 -1.442695, %v1683_v41 }
0x2c50   :  { %v2279_v58 = vpop.f32.mrf.mxu0 }
0x2c51   :  { %2409 = vpow2.f32 %v2026_v43 }
0x2c5e   :  { %v2410_v44 = vpop.eup %2409 }
0x2c5f   :  { %v1687_v10 = vadd.f32 1.0, %v2410_v44 }
0x2c61   :  { %2411 = vrcp.f32 %v1687_v10 }
0x2c6e   :  { %v2412_v45 = vpop.eup %2411 }
0x2c6f   :  { %v1690_v46 = vmul.f32 2.0, %v2412_v45  ;;  %v1692_v50 = vmul.f32 %v2412_v45, %v2948_v6 }
0x2c71   :  { %v2027_v47 = vadd.f32 -1.0, %v1690_v46 }
0x2c73   :  { %1694 = vrot.lane.b32.xlu1 %v2027_v47, %s2573_s18 }
0x2ce5   :  { %v1695_v11 = vpop.permute.xlu1 %1694 }
0x2ce6   :  { %v1697_v48 = vmul.f32 %v2412_v45, %v1695_v11 }
0x2ce8   :  { %1699 = vrot.lane.b32.xlu0 %v1697_v48, %s2582_s3 }
0x2d5a   :  { %v1700_v51 = vpop.permute.xlu0 %1699 }
0x2d5b   :  { %v2980_v52 = vadd.f32 %v1700_v51, %v1692_v50 }
0x2d5d   :  { %2413 = vtanh.f32 %v2980_v52 }
0x2d6a   :  { %v2414_v53 = vpop.eup %2413 }
0x2d6b   :  { %1705 = vrot.lane.b32.xlu1 %v2414_v53, %s2573_s18 }
0x2ddd   :  { %v1706_v54 = vpop.permute.xlu1 %1705 }
0x2dde   :  { %v1708_v55 = vmul.f32 %v2412_v45, %v1706_v54 }
0x2de0   :  { %v1709_v56 = vpack.c.bf16 %v1708_v55, %v1708_v55 }
0x2de2   :  { %1711 = vrot.lane.b32.xlu1 %v1709_v56, %s2582_s3 }
0x2e54   :  { %v1712_v57 = vpop.permute.xlu1 %1711 }
0x2e55   :  { %2285 = vmatmul.mubr.msk.bf16.vlgmr.msra.gmra.mxu1 %vm289_vm2, %v1712_v57  ;;  %2293 = vmatmul.mubr.msk.bf16.vlgmr.msra.gmra.mxu0 %vm289_vm2, %v1712_v57 }
0x2e56   :  { %2297 = vmatpush3.bf16.msra.mxu1 %v2867_v62  ;;  %2298 = vmatprep.mubr.msk.bf16.mxu1 %vm2580_vm0, %v2579_v0 }
0x2e57   :  { %2303 = vmatpush3.bf16.msra.mxu0 %v2838_v33  ;;  %2306 = vmatprep.mubr.msk.bf16.mxu0 %vm2580_vm0, %v2579_v0 }
0x2e58   :  { %2304 = vmatprep.subr.bf16.mxu0 %v2579_v0 }
0x2e5b   :  { %2305 = vmatpush3.bf16.msra.mxu0 %v2841_v34 }
0x2f15   :  { %v1750_v63 = vpop.f32.mrf.mxu1  ;;  %v1814_v59 = vpop.f32.mrf.mxu0 }
0x2f16   :  { %v1751_v1 = vadd.f32 %v2861_v39, %v1750_v63 }
0x2f17   :  { %v2286_v3 = vpop.f32.mrf.mxu1  ;;  %v2294_v4 = vpop.f32.mrf.mxu0 }
0x2f18   :  { %1757 = vst [vmem:[#allocation14 + $0x20] sm:$0xff] %v1751_v1  ;;  %1758 = vmax.xlane.f32.xlu0 %v1751_v1 }
0x2f19   :  { %v1753_v62 = vpop.f32.mrf.mxu1  ;;  %v1817_v6 = vpop.f32.mrf.mxu0 }
0x2f1b   :  { %v2287_v8 = vpop.f32.mrf.mxu1  ;;  %v2295_v60 = vpop.f32.mrf.mxu0 }
0x2fa1   :  { %v1759_v33 = vpop.xlane.xlu0 %1758 }
0x2fa2   :  { %vm1760_vm15 = vcmp.eq.f32.partialorder %v1751_v1, %v1759_v33 }
0x2fa3   :  { %v1761_v9 = vsel %vm1760_vm15, %v2864_v49, 128 }
0x2fa4   :  { %v1763_v12 = vshra.s32 %v1761_v9, 16  ;;  %v1762_v34 = vand.u32 65535, %v1761_v9 }
0x2fa6   :  { %v1765_v13 = vcvt.s32.f32 %v1763_v12  ;;  %v1764_v15 = vcvt.s32.f32 %v1762_v34 }
0x2fa8   :  { %1766 = vmin.xlane.f32.xlu1 %v1765_v13 }
0x3031   :  { %v1767_v14 = vpop.xlane.xlu1 %1766 }
0x3032   :  { %vm1768_vm0 = vcmp.eq.f32.partialorder %v1765_v13, %v1767_v14  ;;  %v1773_v7 = vcvt.f32.s32 %v1767_v14 }
0x3033   :  { %v1769_v16 = vsel %vm1768_vm0, %v1764_v15, inf }
0x3034   :  { %1770 = vmin.xlane.f32.xlu0 %v1769_v16  ;;  %v1774_v18 = vshll.u32 %v1773_v7, 16 }
0x30bd   :  { %v1771_v2 = vpop.xlane.xlu0 %1770 }
0x30be   :  { %v1772_v19 = vcvt.f32.s32 %v1771_v2 }
0x30c0   :  { %v1775_v20 = vadd.s32 %v1774_v18, %v1772_v19 }
0x30c2   :  { %vm1776_vm3 = vcmp.eq.s32.totalorder %v2864_v49, %v1775_v20 }
0x30c3   :  { %v2029_v21 = vsel %vm1776_vm3, 1.0, %v2579_v0 }
0x30c4   :  { %v1779_v5 = vpack.c.bf16 %v2029_v21, %v2029_v21 }
0x30c6   :  { %2299 = vmatmul.mubr.msk.bf16.vlgmr.msra.gmra.mxu1 %vm190_vm1, %v1779_v5 }
0x3186   :  { %v1857_v22 = vpop.f32.mrf.mxu1 }
0x3187   :  { %v1858_v61 = vadd.f32 %v1857_v22, %v1814_v59 }
0x3188   :  { %v2300_v23 = vpop.f32.mrf.mxu1 }
0x3189   :  { %v1863_v24 = vadd.f32 %v2830_v17, %v1858_v61 }
0x318a   :  { %v1860_v25 = vpop.f32.mrf.mxu1 }
0x318b   :  { %v2032_v26 = vmul.f32 -1.442695, %v1863_v24 }
0x318c   :  { %v2301_v27 = vpop.f32.mrf.mxu1 }
0x318d   :  { %2415 = vpow2.f32 %v2032_v26 }
0x319a   :  { %v2416_v28 = vpop.eup %2415 }
0x319b   :  { %v1867_v29 = vadd.f32 1.0, %v2416_v28 }
0x319d   :  { %2417 = vrcp.f32 %v1867_v29 }
0x31aa   :  { %v2418_v30 = vpop.eup %2417 }
0x31ab   :  { %v1870_v31 = vmul.f32 2.0, %v2418_v30  ;;  %v1872_v36 = vmul.f32 %v2418_v30, %v2980_v52 }
0x31ad   :  { %v2033_v49 = vadd.f32 -1.0, %v1870_v31 }
0x31af   :  { %1874 = vrot.lane.b32.xlu0 %v2033_v49, %s2573_s18 }
0x3221   :  { %v1875_v0 = vpop.permute.xlu0 %1874 }
0x3222   :  { %v1877_v35 = vmul.f32 %v2418_v30, %v1875_v0 }
0x3224   :  { %1879 = vrot.lane.b32.xlu1 %v1877_v35, %s2582_s3 }
0x3296   :  { %v1880_v37 = vpop.permute.xlu1 %1879 }
0x3297   :  { %v1882_v17 = vadd.f32 %v1880_v37, %v1872_v36 }
0x3299   :  { %2419 = vtanh.f32 %v1882_v17 }
0x32a6   :  { %v2420_v38 = vpop.eup %2419 }
0x32a7   :  { %1885 = vrot.lane.b32.xlu1 %v2420_v38, %s2573_s18 }
0x3319   :  { %v1886_v32 = vpop.permute.xlu1 %1885 }
0x331a   :  { %v1888_v40 = vmul.f32 %v2418_v30, %v1886_v32 }
0x331c   :  { %v1889_v41 = vpack.c.bf16 %v1888_v40, %v1888_v40 }
0x331e   :  { %1891 = vrot.lane.b32.xlu0 %v1889_v41, %s2582_s3 }
0x3390   :  { %v1892_v42 = vpop.permute.xlu0 %1891 }
0x3391   :  { %2307 = vmatmul.mubr.msk.bf16.vlgmr.msra.gmra.mxu0 %vm289_vm2, %v1892_v42 }
0x3451   :  { %v1930_v43 = vpop.f32.mrf.mxu0 }
0x3452   :  { %v1931_v58 = vadd.f32 %v2861_v39, %v1930_v43 }
0x3453   :  { %v2308_v44 = vpop.f32.mrf.mxu0 }
0x3454   :  { %1937 = vst [vmem:[#allocation14 + $0x28] sm:$0xff] %v1931_v58 }
0x3455   :  { %v1933_v10 = vpop.f32.mrf.mxu0 }
0x3456   :  { %2552 = shalt.err (!%p2549_p6)
}
0x3457   :  { %s2584_s18 = smov 128   ;;  %s2585_s28 = smov 8   ;;  %v2309_v45 = vpop.f32.mrf.mxu0 }
0x3458   :  { %1949 = dma.vmem_to_hbm [thread:$0]  %s1944_s26, 768, %s3021_s10, [#allocation5], %s2584_s18, %s2584_s18, %s2585_s28  }
0x3459   :  { %2569 = dma.done.wait [#allocation5], 768  }
0x345a   :  { %2570 = vsyncadd [#allocation5], 4294966528 }
0x345b   :  { %1953 = vsyncpa [#allocation4], 1 }
0x345c   :  { %1954 = vsyncpa [#allocation7], 1 }
0x345d   :  { %1955 = vsyncpa [#allocation10], 1 }
0x345e   :  { %1956 = vsyncpa [#allocation13], 1 }
0x345f   :  { %1957 = vsyncpa [#allocation5], 1 }

</bundles_post_ra>
